<compile_context>
chip_gen: v5e
topology: v5e:2x2
jax: 0.10.0
libtpu: 0.0.40
codegen_flags: <defaults>
</compile_context>

<pallas_src>
import math

import jax
import jax.numpy as jnp
from jax.experimental import pallas as pl

# ----------------------------- hyper-params ---------------------------------
B = 2            # batch
S = 8            # sequence length
H = 32           # hidden size (stands in for 768)
NH = 4           # attention heads
DH = H // NH     # head dim
L = 2            # encoder layers
FF = 4 * H       # FFN intermediate size
VOCAB = 100
NUM_INTENTS = 5
LN_EPS = 1e-12
OUT_PAD = 128    # lane-dense padded logits width
BS = B * S       # folded token count
BF16 = jnp.bfloat16


# ------------------------------ small helpers -------------------------------
def _gelu(x):
    # tanh-approximate GELU (HF BERT uses erf-GELU; negligible difference here)
    c = math.sqrt(2.0 / math.pi)
    return 0.5 * x * (1.0 + jnp.tanh(c * (x + 0.044715 * x * x * x)))


def _layernorm(x, gamma, beta):
    mu = jnp.mean(x, axis=-1, keepdims=True)
    var = jnp.mean((x - mu) ** 2, axis=-1, keepdims=True)
    return (x - mu) * jax.lax.rsqrt(var + LN_EPS) * gamma + beta


def _mm(a, b):
    # bf16 MXU matmul with f32 accumulate
    return jnp.dot(a.astype(BF16), b.astype(BF16),
                   preferred_element_type=jnp.float32)


def _mm_t(a, b):
    # a @ b.T on the MXU, bf16 inputs, f32 accumulate
    return jax.lax.dot_general(a.astype(BF16), b.astype(BF16),
                               (((1,), (1,)), ((), ())),
                               preferred_element_type=jnp.float32)


# ------------------------------ Pallas kernel --------------------------------
def intent_kernel(x_ref, mask_ref, wqkv_ref, wo_ref, w1_ref, w2_ref,
                  lvec_ref, pool_w_ref, cls_w_ref, head_b_ref, out_ref):
    h = x_ref[...]                      # [B*S, H] f32 residual stream
    # precomputed block-diagonal additive mask for head/batch-stacked scores
    mask = mask_ref[...]                # [NH*B*S, NH*B*S] f32

    for l in range(L):                  # static unroll over layers
        vec = lvec_ref[l]               # [8, 128] packed per-layer vectors
        bqkv = vec[0:1, 0:3 * H]        # [1, 3H]  (q-part pre-scaled by 1/sqrt(DH))
        bo = vec[1:2, 0:H]
        ln1g = vec[2:3, 0:H]
        ln1b = vec[3:4, 0:H]
        b1 = vec[4:5, 0:FF]
        b2 = vec[5:6, 0:H]
        ln2g = vec[6:7, 0:H]
        ln2b = vec[7:8, 0:H]

        # ---- fused QKV projection: one [B*S,H] x [H,3H] matmul ----
        qkv = _mm(h, wqkv_ref[l]) + bqkv                            # [16, 96] f32

        # ---- stack heads along sublanes (head-major, then token) ----
        qs = jnp.concatenate(
            [qkv[:, hd * DH:(hd + 1) * DH] for hd in range(NH)], axis=0)          # [64, 8]
        ks = jnp.concatenate(
            [qkv[:, H + hd * DH:H + (hd + 1) * DH] for hd in range(NH)], axis=0)  # [64, 8]
        vs = jnp.concatenate(
            [qkv[:, 2 * H + hd * DH:2 * H + (hd + 1) * DH] for hd in range(NH)], axis=0)

        # ---- one scores matmul for ALL heads + both batch elements ----
        sc = _mm_t(qs, ks) + mask                                   # [64, 64] f32
        sc = sc - jnp.max(sc, axis=-1, keepdims=True)
        p = jnp.exp(sc)
        p = p * pl.reciprocal(jnp.sum(p, axis=-1, keepdims=True), approx=True)
        ctx_s = _mm(p, vs)                                          # [64, 8] f32

        # ---- heads back onto lanes, fused output projection ----
        ctx = jnp.concatenate(
            [ctx_s[hd * BS:(hd + 1) * BS, :] for hd in range(NH)], axis=1)        # [16, 32]
        attn = _mm(ctx, wo_ref[l]) + bo

        h = _layernorm(h + attn, ln1g, ln1b)

        # ---- feed-forward ----
        ff = _gelu(_mm(h, w1_ref[l]) + b1)                          # [16, FF]
        ff = _mm(ff, w2_ref[l]) + b2                                # [16, H]
        h = _layernorm(h + ff, ln2g, ln2b)

    # BERT pooler: tanh(W * h[CLS] + b); CLS rows are rows b*S of the folded slab
    cls = jnp.concatenate([h[b * S:b * S + 1, :] for b in range(B)], axis=0)       # [B, H]
    pooled = jnp.tanh(_mm(cls, pool_w_ref[...]) + head_b_ref[0:1, :])              # [B, 128]

    # dropout(p=0.3) is the identity in eval mode.
    # TODO(synk): training-mode dropout (pltpu.prng_*) not implemented; eval semantics used.

    # classifier: full 128x128 zero-padded weight -> lane-dense store, no tail slices
    logits = _mm(pooled, cls_w_ref[...]) + head_b_ref[1:2, :]                      # [B, 128]
    out_ref[...] = logits


# ------------------------------ param packing --------------------------------
def _pack_params(params):
    """Pack 22 raw parameter tensors into 8 kernel operands (bf16 matmul weights)."""
    scale = 1.0 / math.sqrt(DH)
    # fold 1/sqrt(DH) into the q-columns of the fused QKV weight/bias (free, wrapper-side)
    wqkv = jnp.concatenate([params['wq'] * scale, params['wk'], params['wv']], axis=-1)  # [L,H,3H]
    bqkv = jnp.concatenate([params['bq'] * scale, params['bk'], params['bv']], axis=-1)  # [L,3H]

    def pad128(v):
        return jnp.pad(v, ((0, 0), (0, 128 - v.shape[-1])))

    # per-layer vectors packed into [L, 8, 128] f32
    # rows: bqkv, bo, ln1g, ln1b, b1, b2, ln2g, ln2b
    lvecs = jnp.stack(
        [pad128(bqkv), pad128(params['bo']),
         pad128(params['ln1_g']), pad128(params['ln1_b']),
         pad128(params['b1']), pad128(params['b2']),
         pad128(params['ln2_g']), pad128(params['ln2_b'])],
        axis=1).astype(jnp.float32)                                            # [L, 8, 128]

    # pooler / classifier weights zero-padded to full lane width (results unchanged:
    # tanh(0)=0 and zero rows contribute 0)
    pool_w_p = pad128(params['pool_w']).astype(BF16)                           # [H, 128]
    cls_w_p = jnp.zeros((OUT_PAD, OUT_PAD), jnp.float32)
    cls_w_p = cls_w_p.at[:H, :NUM_INTENTS].set(params['cls_w']).astype(BF16)   # [128, 128]
    head_b = jnp.concatenate([pad128(params['pool_b']),
                              pad128(params['cls_b'])], axis=0).astype(jnp.float32)  # [2, 128]

    return (wqkv.astype(BF16), params['wo'].astype(BF16),
            params['w1'].astype(BF16), params['w2'].astype(BF16),
            lvecs, pool_w_p, cls_w_p, head_b)


# ------------------------------ wrapper --------------------------------------
def intent_classifier_forward(input_ids, attention_mask, params):
    # --- embedding glue (plain JAX: gather + add + layernorm) ---
    # TODO(synk): could be pulled in-kernel via scalar-prefetch row gather if the
    # extra XLA dispatch ever shows up in a trace.
    x = (params['word_emb'][input_ids]
         + params['pos_emb'][None, :, :]
         + params['type_emb'][0][None, None, :])
    x = _layernorm(x, params['emb_ln_g'], params['emb_ln_b']).astype(jnp.float32)
    x2d = x.reshape(BS, H)                                       # batch folded: [B*S, H]

    # Block-diagonal additive mask for head/batch-stacked attention.
    # Row/col ordering: (head, batch, seq).  Entry is 0 iff same head, same batch
    # element AND the key token is not padding; else -1e9.
    # (Note: a fully-masked row would NaN after softmax; not possible with these
    # synthetic inputs.)
    am = attention_mask.astype(jnp.float32).reshape(BS)                          # key validity
    same_batch = jnp.kron(jnp.eye(B, dtype=jnp.float32),
                          jnp.ones((S, S), jnp.float32))                         # [BS, BS]
    tok = same_batch * am[None, :]
    blk = jnp.kron(jnp.eye(NH, dtype=jnp.float32), tok)                          # [NH*BS, NH*BS]
    add_mask = (1.0 - blk) * jnp.float32(-1.0e9)

    packed = _pack_params(params)

    # Single kernel invocation (no grid): everything fits comfortably in VMEM and
    # single-TC chips gain nothing from a batch grid.
    # TODO(synk): dual-TC v7x variant with grid=(B,) "parallel" gated on a trace.
    out = pl.pallas_call(
        intent_kernel,
        out_shape=jax.ShapeDtypeStruct((B, OUT_PAD), jnp.float32),
    )(x2d, add_mask, *packed)
    return out[:, :NUM_INTENTS]


# ------------------------------ deterministic init ---------------------------
def init_params(key):
    ks = jax.random.split(key, 12)

    def nrm(k, shape):
        return (0.02 * jax.random.normal(k, shape)).astype(jnp.float32)

    z = lambda *s: jnp.zeros(s, jnp.float32)
    o = lambda *s: jnp.ones(s, jnp.float32)
    p = {
        'word_emb': nrm(ks[0], (VOCAB, H)),
        'pos_emb':  nrm(ks[1], (S, H)),
        'type_emb': nrm(ks[2], (2, H)),
        'emb_ln_g': o(H), 'emb_ln_b': z(H),
        'wq': nrm(ks[3], (L, H, H)),  'bq': z(L, H),
        'wk': nrm(ks[4], (L, H, H)),  'bk': z(L, H),
        'wv': nrm(ks[5], (L, H, H)),  'bv': z(L, H),
        'wo': nrm(ks[6], (L, H, H)),  'bo': z(L, H),
        'ln1_g': o(L, H), 'ln1_b': z(L, H),
        'w1': nrm(ks[7], (L, H, FF)), 'b1': z(L, FF),
        'w2': nrm(ks[8], (L, FF, H)), 'b2': z(L, H),
        'ln2_g': o(L, H), 'ln2_b': z(L, H),
        'pool_w': nrm(ks[9], (H, H)),            'pool_b': z(1, H),
        'cls_w':  nrm(ks[10], (H, NUM_INTENTS)), 'cls_b':  z(1, NUM_INTENTS),
    }
    return p


# ------------------------------ main ------------------------------------------
if __name__ == "__main__":
    key = jax.random.PRNGKey(0)
    pkey, ikey = jax.random.split(key)
    params = init_params(pkey)

    input_ids = jax.random.randint(ikey, (B, S), 0, VOCAB, dtype=jnp.int32)
    attention_mask = jnp.ones((B, S), jnp.int32).at[:, 6:].set(0)  # pad last 2 tokens

    fwd = jax.jit(intent_classifier_forward)
    logits = fwd(input_ids, attention_mask, params)
    jax.block_until_ready(logits)

    assert logits.shape == (B, NUM_INTENTS), logits.shape
    assert bool(jnp.all(jnp.isfinite(logits)))
    print("KERNEL_OK")
</pallas_src>

<mosaic_0001>
module attributes {stable_mosaic.version = 11 : i64} {
  func.func @intent_kernel(%arg0: memref<16x32xf32, #tpu.memory_space<vmem>>, %arg1: memref<64x64xf32, #tpu.memory_space<vmem>>, %arg2: memref<2x32x96xbf16, #tpu.memory_space<vmem>>, %arg3: memref<2x32x32xbf16, #tpu.memory_space<vmem>>, %arg4: memref<2x32x128xbf16, #tpu.memory_space<vmem>>, %arg5: memref<2x128x32xbf16, #tpu.memory_space<vmem>>, %arg6: memref<2x8x128xf32, #tpu.memory_space<vmem>>, %arg7: memref<32x128xbf16, #tpu.memory_space<vmem>>, %arg8: memref<128x128xbf16, #tpu.memory_space<vmem>>, %arg9: memref<2x128xf32, #tpu.memory_space<vmem>>, %arg10: memref<2x128xf32, #tpu.memory_space<vmem>>) attributes {dimension_semantics = [], scalar_prefetch = 0 : i64, scratch_operands = 0 : i64, tpu.core_type = #tpu.core_type<tc>} {
    %c0 = arith.constant 0 : index
    %c0_0 = arith.constant 0 : index
    %0 = vector.load %arg0[%c0, %c0_0] : memref<16x32xf32, #tpu.memory_space<vmem>>, vector<16x32xf32>
    %c0_1 = arith.constant 0 : index
    %c0_2 = arith.constant 0 : index
    %1 = vector.load %arg1[%c0_1, %c0_2] : memref<64x64xf32, #tpu.memory_space<vmem>>, vector<64x64xf32>
    %c0_3 = arith.constant 0 : index
    %c0_4 = arith.constant 0 : index
    %c0_5 = arith.constant 0 : index
    %2 = vector.load %arg6[%c0_3, %c0_4, %c0_5] : memref<2x8x128xf32, #tpu.memory_space<vmem>>, vector<1x8x128xf32>
    %3 = vector.shape_cast %2 : vector<1x8x128xf32> to vector<8x128xf32>
    %4 = vector.extract_strided_slice %3 {offsets = [0, 0], sizes = [1, 96], strides = [1, 1]} : vector<8x128xf32> to vector<1x96xf32>
    %5 = vector.extract_strided_slice %3 {offsets = [1, 0], sizes = [1, 32], strides = [1, 1]} : vector<8x128xf32> to vector<1x32xf32>
    %6 = vector.extract_strided_slice %3 {offsets = [2, 0], sizes = [1, 32], strides = [1, 1]} : vector<8x128xf32> to vector<1x32xf32>
    %7 = vector.extract_strided_slice %3 {offsets = [3, 0], sizes = [1, 32], strides = [1, 1]} : vector<8x128xf32> to vector<1x32xf32>
    %8 = vector.extract_strided_slice %3 {offsets = [4, 0], sizes = [1, 128], strides = [1, 1]} : vector<8x128xf32> to vector<1x128xf32>
    %9 = vector.extract_strided_slice %3 {offsets = [5, 0], sizes = [1, 32], strides = [1, 1]} : vector<8x128xf32> to vector<1x32xf32>
    %10 = vector.extract_strided_slice %3 {offsets = [6, 0], sizes = [1, 32], strides = [1, 1]} : vector<8x128xf32> to vector<1x32xf32>
    %11 = vector.extract_strided_slice %3 {offsets = [7, 0], sizes = [1, 32], strides = [1, 1]} : vector<8x128xf32> to vector<1x32xf32>
    %c0_6 = arith.constant 0 : index
    %c0_7 = arith.constant 0 : index
    %c0_8 = arith.constant 0 : index
    %12 = vector.load %arg2[%c0_6, %c0_7, %c0_8] : memref<2x32x96xbf16, #tpu.memory_space<vmem>>, vector<1x32x96xbf16>
    %13 = vector.shape_cast %12 : vector<1x32x96xbf16> to vector<32x96xbf16>
    %14 = arith.truncf %0 : vector<16x32xf32> to vector<16x32xbf16>
    %cst = arith.constant dense<0.000000e+00> : vector<16x96xf32>
    %15 = tpu.matmul %14, %13, %cst {dimension_numbers = #tpu.dot_dimension_numbers<[1], [0], [0], [1], [0, 0, 1, 1], [], []>} : vector<16x32xbf16>, vector<32x96xbf16>, vector<16x96xf32> -> vector<16x96xf32>
    %16 = vector.broadcast %4 : vector<1x96xf32> to vector<16x96xf32>
    %17 = arith.addf %15, %16 : vector<16x96xf32>
    %18 = vector.extract_strided_slice %17 {offsets = [0, 0], sizes = [16, 8], strides = [1, 1]} : vector<16x96xf32> to vector<16x8xf32>
    %19 = vector.extract_strided_slice %17 {offsets = [0, 8], sizes = [16, 8], strides = [1, 1]} : vector<16x96xf32> to vector<16x8xf32>
    %20 = vector.extract_strided_slice %17 {offsets = [0, 16], sizes = [16, 8], strides = [1, 1]} : vector<16x96xf32> to vector<16x8xf32>
    %21 = vector.extract_strided_slice %17 {offsets = [0, 24], sizes = [16, 8], strides = [1, 1]} : vector<16x96xf32> to vector<16x8xf32>
    %22 = tpu.concatenate %18, %19, %20, %21 in 0 : vector<16x8xf32>, vector<16x8xf32>, vector<16x8xf32>, vector<16x8xf32> -> vector<64x8xf32>
    %23 = vector.extract_strided_slice %17 {offsets = [0, 32], sizes = [16, 8], strides = [1, 1]} : vector<16x96xf32> to vector<16x8xf32>
    %24 = vector.extract_strided_slice %17 {offsets = [0, 40], sizes = [16, 8], strides = [1, 1]} : vector<16x96xf32> to vector<16x8xf32>
    %25 = vector.extract_strided_slice %17 {offsets = [0, 48], sizes = [16, 8], strides = [1, 1]} : vector<16x96xf32> to vector<16x8xf32>
    %26 = vector.extract_strided_slice %17 {offsets = [0, 56], sizes = [16, 8], strides = [1, 1]} : vector<16x96xf32> to vector<16x8xf32>
    %27 = tpu.concatenate %23, %24, %25, %26 in 0 : vector<16x8xf32>, vector<16x8xf32>, vector<16x8xf32>, vector<16x8xf32> -> vector<64x8xf32>
    %28 = vector.extract_strided_slice %17 {offsets = [0, 64], sizes = [16, 8], strides = [1, 1]} : vector<16x96xf32> to vector<16x8xf32>
    %29 = vector.extract_strided_slice %17 {offsets = [0, 72], sizes = [16, 8], strides = [1, 1]} : vector<16x96xf32> to vector<16x8xf32>
    %30 = vector.extract_strided_slice %17 {offsets = [0, 80], sizes = [16, 8], strides = [1, 1]} : vector<16x96xf32> to vector<16x8xf32>
    %31 = vector.extract_strided_slice %17 {offsets = [0, 88], sizes = [16, 8], strides = [1, 1]} : vector<16x96xf32> to vector<16x8xf32>
    %32 = tpu.concatenate %28, %29, %30, %31 in 0 : vector<16x8xf32>, vector<16x8xf32>, vector<16x8xf32>, vector<16x8xf32> -> vector<64x8xf32>
    %33 = arith.truncf %22 : vector<64x8xf32> to vector<64x8xbf16>
    %34 = arith.truncf %27 : vector<64x8xf32> to vector<64x8xbf16>
    %cst_9 = arith.constant dense<0.000000e+00> : vector<64x64xf32>
    %35 = tpu.matmul %33, %34, %cst_9 {dimension_numbers = #tpu.dot_dimension_numbers<[1], [1], [0], [0], [0, 0, 1, 0], [], []>} : vector<64x8xbf16>, vector<64x8xbf16>, vector<64x64xf32> -> vector<64x64xf32>
    %36 = arith.addf %35, %1 : vector<64x64xf32>
    %cst_10 = arith.constant dense<0xFF800000> : vector<64xf32>
    %37 = vector.multi_reduction <maximumf>, %36, %cst_10 [1] : vector<64x64xf32> to vector<64xf32>
    %38 = vector.shape_cast %37 : vector<64xf32> to vector<64x1xf32>
    %39 = vector.broadcast %38 : vector<64x1xf32> to vector<64x64xf32>
    %40 = arith.subf %36, %39 : vector<64x64xf32>
    %41 = math.exp %40 : vector<64x64xf32>
    %cst_11 = arith.constant dense<0.000000e+00> : vector<64xf32>
    %42 = vector.multi_reduction <add>, %41, %cst_11 [1] : vector<64x64xf32> to vector<64xf32>
    %43 = vector.shape_cast %42 : vector<64xf32> to vector<64x1xf32>
    %44 = tpu.reciprocal %43 {approx = true} : vector<64x1xf32> -> vector<64x1xf32>
    %45 = vector.broadcast %44 : vector<64x1xf32> to vector<64x64xf32>
    %46 = arith.mulf %41, %45 : vector<64x64xf32>
    %47 = arith.truncf %46 : vector<64x64xf32> to vector<64x64xbf16>
    %48 = arith.truncf %32 : vector<64x8xf32> to vector<64x8xbf16>
    %cst_12 = arith.constant dense<0.000000e+00> : vector<64x8xf32>
    %49 = tpu.matmul %47, %48, %cst_12 {dimension_numbers = #tpu.dot_dimension_numbers<[1], [0], [0], [1], [0, 0, 1, 1], [], []>} : vector<64x64xbf16>, vector<64x8xbf16>, vector<64x8xf32> -> vector<64x8xf32>
    %50 = vector.extract_strided_slice %49 {offsets = [0, 0], sizes = [16, 8], strides = [1, 1]} : vector<64x8xf32> to vector<16x8xf32>
    %51 = vector.extract_strided_slice %49 {offsets = [16, 0], sizes = [16, 8], strides = [1, 1]} : vector<64x8xf32> to vector<16x8xf32>
    %52 = vector.extract_strided_slice %49 {offsets = [32, 0], sizes = [16, 8], strides = [1, 1]} : vector<64x8xf32> to vector<16x8xf32>
    %53 = vector.extract_strided_slice %49 {offsets = [48, 0], sizes = [16, 8], strides = [1, 1]} : vector<64x8xf32> to vector<16x8xf32>
    %54 = tpu.concatenate %50, %51, %52, %53 in 1 : vector<16x8xf32>, vector<16x8xf32>, vector<16x8xf32>, vector<16x8xf32> -> vector<16x32xf32>
    %c0_13 = arith.constant 0 : index
    %c0_14 = arith.constant 0 : index
    %c0_15 = arith.constant 0 : index
    %55 = vector.load %arg3[%c0_13, %c0_14, %c0_15] : memref<2x32x32xbf16, #tpu.memory_space<vmem>>, vector<1x32x32xbf16>
    %56 = vector.shape_cast %55 : vector<1x32x32xbf16> to vector<32x32xbf16>
    %57 = arith.truncf %54 : vector<16x32xf32> to vector<16x32xbf16>
    %cst_16 = arith.constant dense<0.000000e+00> : vector<16x32xf32>
    %58 = tpu.matmul %57, %56, %cst_16 {dimension_numbers = #tpu.dot_dimension_numbers<[1], [0], [0], [1], [0, 0, 1, 1], [], []>} : vector<16x32xbf16>, vector<32x32xbf16>, vector<16x32xf32> -> vector<16x32xf32>
    %59 = vector.broadcast %5 : vector<1x32xf32> to vector<16x32xf32>
    %60 = arith.addf %58, %59 : vector<16x32xf32>
    %61 = arith.addf %0, %60 : vector<16x32xf32>
    %cst_17 = arith.constant dense<0.000000e+00> : vector<16xf32>
    %62 = vector.multi_reduction <add>, %61, %cst_17 [1] : vector<16x32xf32> to vector<16xf32>
    %63 = vector.shape_cast %62 : vector<16xf32> to vector<16x1xf32>
    %cst_18 = arith.constant 3.200000e+01 : f32
    %64 = vector.broadcast %cst_18 : f32 to vector<16x1xf32>
    %65 = arith.divf %63, %64 : vector<16x1xf32>
    %66 = vector.broadcast %65 : vector<16x1xf32> to vector<16x32xf32>
    %67 = arith.subf %61, %66 : vector<16x32xf32>
    %68 = arith.mulf %67, %67 : vector<16x32xf32>
    %cst_19 = arith.constant dense<0.000000e+00> : vector<16xf32>
    %69 = vector.multi_reduction <add>, %68, %cst_19 [1] : vector<16x32xf32> to vector<16xf32>
    %70 = vector.shape_cast %69 : vector<16xf32> to vector<16x1xf32>
    %cst_20 = arith.constant 3.200000e+01 : f32
    %71 = vector.broadcast %cst_20 : f32 to vector<16x1xf32>
    %72 = arith.divf %70, %71 : vector<16x1xf32>
    %73 = vector.broadcast %65 : vector<16x1xf32> to vector<16x32xf32>
    %74 = arith.subf %61, %73 : vector<16x32xf32>
    %cst_21 = arith.constant 9.99999996E-13 : f32
    %75 = vector.broadcast %cst_21 : f32 to vector<16x1xf32>
    %76 = arith.addf %72, %75 : vector<16x1xf32>
    %77 = math.rsqrt %76 : vector<16x1xf32>
    %78 = vector.broadcast %77 : vector<16x1xf32> to vector<16x32xf32>
    %79 = arith.mulf %74, %78 : vector<16x32xf32>
    %80 = vector.broadcast %6 : vector<1x32xf32> to vector<16x32xf32>
    %81 = arith.mulf %79, %80 : vector<16x32xf32>
    %82 = vector.broadcast %7 : vector<1x32xf32> to vector<16x32xf32>
    %83 = arith.addf %81, %82 : vector<16x32xf32>
    %c0_22 = arith.constant 0 : index
    %c0_23 = arith.constant 0 : index
    %c0_24 = arith.constant 0 : index
    %84 = vector.load %arg4[%c0_22, %c0_23, %c0_24] : memref<2x32x128xbf16, #tpu.memory_space<vmem>>, vector<1x32x128xbf16>
    %85 = vector.shape_cast %84 : vector<1x32x128xbf16> to vector<32x128xbf16>
    %86 = arith.truncf %83 : vector<16x32xf32> to vector<16x32xbf16>
    %cst_25 = arith.constant dense<0.000000e+00> : vector<16x128xf32>
    %87 = tpu.matmul %86, %85, %cst_25 {dimension_numbers = #tpu.dot_dimension_numbers<[1], [0], [0], [1], [0, 0, 1, 1], [], []>} : vector<16x32xbf16>, vector<32x128xbf16>, vector<16x128xf32> -> vector<16x128xf32>
    %88 = vector.broadcast %8 : vector<1x128xf32> to vector<16x128xf32>
    %89 = arith.addf %87, %88 : vector<16x128xf32>
    %cst_26 = arith.constant 5.000000e-01 : f32
    %90 = vector.broadcast %cst_26 : f32 to vector<16x128xf32>
    %91 = arith.mulf %90, %89 : vector<16x128xf32>
    %cst_27 = arith.constant 4.471500e-02 : f32
    %92 = vector.broadcast %cst_27 : f32 to vector<16x128xf32>
    %93 = arith.mulf %92, %89 : vector<16x128xf32>
    %94 = arith.mulf %93, %89 : vector<16x128xf32>
    %95 = arith.mulf %94, %89 : vector<16x128xf32>
    %96 = arith.addf %89, %95 : vector<16x128xf32>
    %cst_28 = arith.constant 0.797884583 : f32
    %97 = vector.broadcast %cst_28 : f32 to vector<16x128xf32>
    %98 = arith.mulf %97, %96 : vector<16x128xf32>
    %99 = math.tanh %98 : vector<16x128xf32>
    %cst_29 = arith.constant 1.000000e+00 : f32
    %100 = vector.broadcast %cst_29 : f32 to vector<16x128xf32>
    %101 = arith.addf %100, %99 : vector<16x128xf32>
    %102 = arith.mulf %91, %101 : vector<16x128xf32>
    %c0_30 = arith.constant 0 : index
    %c0_31 = arith.constant 0 : index
    %c0_32 = arith.constant 0 : index
    %103 = vector.load %arg5[%c0_30, %c0_31, %c0_32] : memref<2x128x32xbf16, #tpu.memory_space<vmem>>, vector<1x128x32xbf16>
    %104 = vector.shape_cast %103 : vector<1x128x32xbf16> to vector<128x32xbf16>
    %105 = arith.truncf %102 : vector<16x128xf32> to vector<16x128xbf16>
    %cst_33 = arith.constant dense<0.000000e+00> : vector<16x32xf32>
    %106 = tpu.matmul %105, %104, %cst_33 {dimension_numbers = #tpu.dot_dimension_numbers<[1], [0], [0], [1], [0, 0, 1, 1], [], []>} : vector<16x128xbf16>, vector<128x32xbf16>, vector<16x32xf32> -> vector<16x32xf32>
    %107 = vector.broadcast %9 : vector<1x32xf32> to vector<16x32xf32>
    %108 = arith.addf %106, %107 : vector<16x32xf32>
    %109 = arith.addf %83, %108 : vector<16x32xf32>
    %cst_34 = arith.constant dense<0.000000e+00> : vector<16xf32>
    %110 = vector.multi_reduction <add>, %109, %cst_34 [1] : vector<16x32xf32> to vector<16xf32>
    %111 = vector.shape_cast %110 : vector<16xf32> to vector<16x1xf32>
    %cst_35 = arith.constant 3.200000e+01 : f32
    %112 = vector.broadcast %cst_35 : f32 to vector<16x1xf32>
    %113 = arith.divf %111, %112 : vector<16x1xf32>
    %114 = vector.broadcast %113 : vector<16x1xf32> to vector<16x32xf32>
    %115 = arith.subf %109, %114 : vector<16x32xf32>
    %116 = arith.mulf %115, %115 : vector<16x32xf32>
    %cst_36 = arith.constant dense<0.000000e+00> : vector<16xf32>
    %117 = vector.multi_reduction <add>, %116, %cst_36 [1] : vector<16x32xf32> to vector<16xf32>
    %118 = vector.shape_cast %117 : vector<16xf32> to vector<16x1xf32>
    %cst_37 = arith.constant 3.200000e+01 : f32
    %119 = vector.broadcast %cst_37 : f32 to vector<16x1xf32>
    %120 = arith.divf %118, %119 : vector<16x1xf32>
    %121 = vector.broadcast %113 : vector<16x1xf32> to vector<16x32xf32>
    %122 = arith.subf %109, %121 : vector<16x32xf32>
    %cst_38 = arith.constant 9.99999996E-13 : f32
    %123 = vector.broadcast %cst_38 : f32 to vector<16x1xf32>
    %124 = arith.addf %120, %123 : vector<16x1xf32>
    %125 = math.rsqrt %124 : vector<16x1xf32>
    %126 = vector.broadcast %125 : vector<16x1xf32> to vector<16x32xf32>
    %127 = arith.mulf %122, %126 : vector<16x32xf32>
    %128 = vector.broadcast %10 : vector<1x32xf32> to vector<16x32xf32>
    %129 = arith.mulf %127, %128 : vector<16x32xf32>
    %130 = vector.broadcast %11 : vector<1x32xf32> to vector<16x32xf32>
    %131 = arith.addf %129, %130 : vector<16x32xf32>
    %c1 = arith.constant 1 : index
    %c0_39 = arith.constant 0 : index
    %c0_40 = arith.constant 0 : index
    %132 = vector.load %arg6[%c1, %c0_39, %c0_40] : memref<2x8x128xf32, #tpu.memory_space<vmem>>, vector<1x8x128xf32>
    %133 = vector.shape_cast %132 : vector<1x8x128xf32> to vector<8x128xf32>
    %134 = vector.extract_strided_slice %133 {offsets = [0, 0], sizes = [1, 96], strides = [1, 1]} : vector<8x128xf32> to vector<1x96xf32>
    %135 = vector.extract_strided_slice %133 {offsets = [1, 0], sizes = [1, 32], strides = [1, 1]} : vector<8x128xf32> to vector<1x32xf32>
    %136 = vector.extract_strided_slice %133 {offsets = [2, 0], sizes = [1, 32], strides = [1, 1]} : vector<8x128xf32> to vector<1x32xf32>
    %137 = vector.extract_strided_slice %133 {offsets = [3, 0], sizes = [1, 32], strides = [1, 1]} : vector<8x128xf32> to vector<1x32xf32>
    %138 = vector.extract_strided_slice %133 {offsets = [4, 0], sizes = [1, 128], strides = [1, 1]} : vector<8x128xf32> to vector<1x128xf32>
    %139 = vector.extract_strided_slice %133 {offsets = [5, 0], sizes = [1, 32], strides = [1, 1]} : vector<8x128xf32> to vector<1x32xf32>
    %140 = vector.extract_strided_slice %133 {offsets = [6, 0], sizes = [1, 32], strides = [1, 1]} : vector<8x128xf32> to vector<1x32xf32>
    %141 = vector.extract_strided_slice %133 {offsets = [7, 0], sizes = [1, 32], strides = [1, 1]} : vector<8x128xf32> to vector<1x32xf32>
    %c1_41 = arith.constant 1 : index
    %c0_42 = arith.constant 0 : index
    %c0_43 = arith.constant 0 : index
    %142 = vector.load %arg2[%c1_41, %c0_42, %c0_43] : memref<2x32x96xbf16, #tpu.memory_space<vmem>>, vector<1x32x96xbf16>
    %143 = vector.shape_cast %142 : vector<1x32x96xbf16> to vector<32x96xbf16>
    %144 = arith.truncf %131 : vector<16x32xf32> to vector<16x32xbf16>
    %cst_44 = arith.constant dense<0.000000e+00> : vector<16x96xf32>
    %145 = tpu.matmul %144, %143, %cst_44 {dimension_numbers = #tpu.dot_dimension_numbers<[1], [0], [0], [1], [0, 0, 1, 1], [], []>} : vector<16x32xbf16>, vector<32x96xbf16>, vector<16x96xf32> -> vector<16x96xf32>
    %146 = vector.broadcast %134 : vector<1x96xf32> to vector<16x96xf32>
    %147 = arith.addf %145, %146 : vector<16x96xf32>
    %148 = vector.extract_strided_slice %147 {offsets = [0, 0], sizes = [16, 8], strides = [1, 1]} : vector<16x96xf32> to vector<16x8xf32>
    %149 = vector.extract_strided_slice %147 {offsets = [0, 8], sizes = [16, 8], strides = [1, 1]} : vector<16x96xf32> to vector<16x8xf32>
    %150 = vector.extract_strided_slice %147 {offsets = [0, 16], sizes = [16, 8], strides = [1, 1]} : vector<16x96xf32> to vector<16x8xf32>
    %151 = vector.extract_strided_slice %147 {offsets = [0, 24], sizes = [16, 8], strides = [1, 1]} : vector<16x96xf32> to vector<16x8xf32>
    %152 = tpu.concatenate %148, %149, %150, %151 in 0 : vector<16x8xf32>, vector<16x8xf32>, vector<16x8xf32>, vector<16x8xf32> -> vector<64x8xf32>
    %153 = vector.extract_strided_slice %147 {offsets = [0, 32], sizes = [16, 8], strides = [1, 1]} : vector<16x96xf32> to vector<16x8xf32>
    %154 = vector.extract_strided_slice %147 {offsets = [0, 40], sizes = [16, 8], strides = [1, 1]} : vector<16x96xf32> to vector<16x8xf32>
    %155 = vector.extract_strided_slice %147 {offsets = [0, 48], sizes = [16, 8], strides = [1, 1]} : vector<16x96xf32> to vector<16x8xf32>
    %156 = vector.extract_strided_slice %147 {offsets = [0, 56], sizes = [16, 8], strides = [1, 1]} : vector<16x96xf32> to vector<16x8xf32>
    %157 = tpu.concatenate %153, %154, %155, %156 in 0 : vector<16x8xf32>, vector<16x8xf32>, vector<16x8xf32>, vector<16x8xf32> -> vector<64x8xf32>
    %158 = vector.extract_strided_slice %147 {offsets = [0, 64], sizes = [16, 8], strides = [1, 1]} : vector<16x96xf32> to vector<16x8xf32>
    %159 = vector.extract_strided_slice %147 {offsets = [0, 72], sizes = [16, 8], strides = [1, 1]} : vector<16x96xf32> to vector<16x8xf32>
    %160 = vector.extract_strided_slice %147 {offsets = [0, 80], sizes = [16, 8], strides = [1, 1]} : vector<16x96xf32> to vector<16x8xf32>
    %161 = vector.extract_strided_slice %147 {offsets = [0, 88], sizes = [16, 8], strides = [1, 1]} : vector<16x96xf32> to vector<16x8xf32>
    %162 = tpu.concatenate %158, %159, %160, %161 in 0 : vector<16x8xf32>, vector<16x8xf32>, vector<16x8xf32>, vector<16x8xf32> -> vector<64x8xf32>
    %163 = arith.truncf %152 : vector<64x8xf32> to vector<64x8xbf16>
    %164 = arith.truncf %157 : vector<64x8xf32> to vector<64x8xbf16>
    %cst_45 = arith.constant dense<0.000000e+00> : vector<64x64xf32>
    %165 = tpu.matmul %163, %164, %cst_45 {dimension_numbers = #tpu.dot_dimension_numbers<[1], [1], [0], [0], [0, 0, 1, 0], [], []>} : vector<64x8xbf16>, vector<64x8xbf16>, vector<64x64xf32> -> vector<64x64xf32>
    %166 = arith.addf %165, %1 : vector<64x64xf32>
    %cst_46 = arith.constant dense<0xFF800000> : vector<64xf32>
    %167 = vector.multi_reduction <maximumf>, %166, %cst_46 [1] : vector<64x64xf32> to vector<64xf32>
    %168 = vector.shape_cast %167 : vector<64xf32> to vector<64x1xf32>
    %169 = vector.broadcast %168 : vector<64x1xf32> to vector<64x64xf32>
    %170 = arith.subf %166, %169 : vector<64x64xf32>
    %171 = math.exp %170 : vector<64x64xf32>
    %cst_47 = arith.constant dense<0.000000e+00> : vector<64xf32>
    %172 = vector.multi_reduction <add>, %171, %cst_47 [1] : vector<64x64xf32> to vector<64xf32>
    %173 = vector.shape_cast %172 : vector<64xf32> to vector<64x1xf32>
    %174 = tpu.reciprocal %173 {approx = true} : vector<64x1xf32> -> vector<64x1xf32>
    %175 = vector.broadcast %174 : vector<64x1xf32> to vector<64x64xf32>
    %176 = arith.mulf %171, %175 : vector<64x64xf32>
    %177 = arith.truncf %176 : vector<64x64xf32> to vector<64x64xbf16>
    %178 = arith.truncf %162 : vector<64x8xf32> to vector<64x8xbf16>
    %cst_48 = arith.constant dense<0.000000e+00> : vector<64x8xf32>
    %179 = tpu.matmul %177, %178, %cst_48 {dimension_numbers = #tpu.dot_dimension_numbers<[1], [0], [0], [1], [0, 0, 1, 1], [], []>} : vector<64x64xbf16>, vector<64x8xbf16>, vector<64x8xf32> -> vector<64x8xf32>
    %180 = vector.extract_strided_slice %179 {offsets = [0, 0], sizes = [16, 8], strides = [1, 1]} : vector<64x8xf32> to vector<16x8xf32>
    %181 = vector.extract_strided_slice %179 {offsets = [16, 0], sizes = [16, 8], strides = [1, 1]} : vector<64x8xf32> to vector<16x8xf32>
    %182 = vector.extract_strided_slice %179 {offsets = [32, 0], sizes = [16, 8], strides = [1, 1]} : vector<64x8xf32> to vector<16x8xf32>
    %183 = vector.extract_strided_slice %179 {offsets = [48, 0], sizes = [16, 8], strides = [1, 1]} : vector<64x8xf32> to vector<16x8xf32>
    %184 = tpu.concatenate %180, %181, %182, %183 in 1 : vector<16x8xf32>, vector<16x8xf32>, vector<16x8xf32>, vector<16x8xf32> -> vector<16x32xf32>
    %c1_49 = arith.constant 1 : index
    %c0_50 = arith.constant 0 : index
    %c0_51 = arith.constant 0 : index
    %185 = vector.load %arg3[%c1_49, %c0_50, %c0_51] : memref<2x32x32xbf16, #tpu.memory_space<vmem>>, vector<1x32x32xbf16>
    %186 = vector.shape_cast %185 : vector<1x32x32xbf16> to vector<32x32xbf16>
    %187 = arith.truncf %184 : vector<16x32xf32> to vector<16x32xbf16>
    %cst_52 = arith.constant dense<0.000000e+00> : vector<16x32xf32>
    %188 = tpu.matmul %187, %186, %cst_52 {dimension_numbers = #tpu.dot_dimension_numbers<[1], [0], [0], [1], [0, 0, 1, 1], [], []>} : vector<16x32xbf16>, vector<32x32xbf16>, vector<16x32xf32> -> vector<16x32xf32>
    %189 = vector.broadcast %135 : vector<1x32xf32> to vector<16x32xf32>
    %190 = arith.addf %188, %189 : vector<16x32xf32>
    %191 = arith.addf %131, %190 : vector<16x32xf32>
    %cst_53 = arith.constant dense<0.000000e+00> : vector<16xf32>
    %192 = vector.multi_reduction <add>, %191, %cst_53 [1] : vector<16x32xf32> to vector<16xf32>
    %193 = vector.shape_cast %192 : vector<16xf32> to vector<16x1xf32>
    %cst_54 = arith.constant 3.200000e+01 : f32
    %194 = vector.broadcast %cst_54 : f32 to vector<16x1xf32>
    %195 = arith.divf %193, %194 : vector<16x1xf32>
    %196 = vector.broadcast %195 : vector<16x1xf32> to vector<16x32xf32>
    %197 = arith.subf %191, %196 : vector<16x32xf32>
    %198 = arith.mulf %197, %197 : vector<16x32xf32>
    %cst_55 = arith.constant dense<0.000000e+00> : vector<16xf32>
    %199 = vector.multi_reduction <add>, %198, %cst_55 [1] : vector<16x32xf32> to vector<16xf32>
    %200 = vector.shape_cast %199 : vector<16xf32> to vector<16x1xf32>
    %cst_56 = arith.constant 3.200000e+01 : f32
    %201 = vector.broadcast %cst_56 : f32 to vector<16x1xf32>
    %202 = arith.divf %200, %201 : vector<16x1xf32>
    %203 = vector.broadcast %195 : vector<16x1xf32> to vector<16x32xf32>
    %204 = arith.subf %191, %203 : vector<16x32xf32>
    %cst_57 = arith.constant 9.99999996E-13 : f32
    %205 = vector.broadcast %cst_57 : f32 to vector<16x1xf32>
    %206 = arith.addf %202, %205 : vector<16x1xf32>
    %207 = math.rsqrt %206 : vector<16x1xf32>
    %208 = vector.broadcast %207 : vector<16x1xf32> to vector<16x32xf32>
    %209 = arith.mulf %204, %208 : vector<16x32xf32>
    %210 = vector.broadcast %136 : vector<1x32xf32> to vector<16x32xf32>
    %211 = arith.mulf %209, %210 : vector<16x32xf32>
    %212 = vector.broadcast %137 : vector<1x32xf32> to vector<16x32xf32>
    %213 = arith.addf %211, %212 : vector<16x32xf32>
    %c1_58 = arith.constant 1 : index
    %c0_59 = arith.constant 0 : index
    %c0_60 = arith.constant 0 : index
    %214 = vector.load %arg4[%c1_58, %c0_59, %c0_60] : memref<2x32x128xbf16, #tpu.memory_space<vmem>>, vector<1x32x128xbf16>
    %215 = vector.shape_cast %214 : vector<1x32x128xbf16> to vector<32x128xbf16>
    %216 = arith.truncf %213 : vector<16x32xf32> to vector<16x32xbf16>
    %cst_61 = arith.constant dense<0.000000e+00> : vector<16x128xf32>
    %217 = tpu.matmul %216, %215, %cst_61 {dimension_numbers = #tpu.dot_dimension_numbers<[1], [0], [0], [1], [0, 0, 1, 1], [], []>} : vector<16x32xbf16>, vector<32x128xbf16>, vector<16x128xf32> -> vector<16x128xf32>
    %218 = vector.broadcast %138 : vector<1x128xf32> to vector<16x128xf32>
    %219 = arith.addf %217, %218 : vector<16x128xf32>
    %cst_62 = arith.constant 5.000000e-01 : f32
    %220 = vector.broadcast %cst_62 : f32 to vector<16x128xf32>
    %221 = arith.mulf %220, %219 : vector<16x128xf32>
    %cst_63 = arith.constant 4.471500e-02 : f32
    %222 = vector.broadcast %cst_63 : f32 to vector<16x128xf32>
    %223 = arith.mulf %222, %219 : vector<16x128xf32>
    %224 = arith.mulf %223, %219 : vector<16x128xf32>
    %225 = arith.mulf %224, %219 : vector<16x128xf32>
    %226 = arith.addf %219, %225 : vector<16x128xf32>
    %cst_64 = arith.constant 0.797884583 : f32
    %227 = vector.broadcast %cst_64 : f32 to vector<16x128xf32>
    %228 = arith.mulf %227, %226 : vector<16x128xf32>
    %229 = math.tanh %228 : vector<16x128xf32>
    %cst_65 = arith.constant 1.000000e+00 : f32
    %230 = vector.broadcast %cst_65 : f32 to vector<16x128xf32>
    %231 = arith.addf %230, %229 : vector<16x128xf32>
    %232 = arith.mulf %221, %231 : vector<16x128xf32>
    %c1_66 = arith.constant 1 : index
    %c0_67 = arith.constant 0 : index
    %c0_68 = arith.constant 0 : index
    %233 = vector.load %arg5[%c1_66, %c0_67, %c0_68] : memref<2x128x32xbf16, #tpu.memory_space<vmem>>, vector<1x128x32xbf16>
    %234 = vector.shape_cast %233 : vector<1x128x32xbf16> to vector<128x32xbf16>
    %235 = arith.truncf %232 : vector<16x128xf32> to vector<16x128xbf16>
    %cst_69 = arith.constant dense<0.000000e+00> : vector<16x32xf32>
    %236 = tpu.matmul %235, %234, %cst_69 {dimension_numbers = #tpu.dot_dimension_numbers<[1], [0], [0], [1], [0, 0, 1, 1], [], []>} : vector<16x128xbf16>, vector<128x32xbf16>, vector<16x32xf32> -> vector<16x32xf32>
    %237 = vector.broadcast %139 : vector<1x32xf32> to vector<16x32xf32>
    %238 = arith.addf %236, %237 : vector<16x32xf32>
    %239 = arith.addf %213, %238 : vector<16x32xf32>
    %cst_70 = arith.constant dense<0.000000e+00> : vector<16xf32>
    %240 = vector.multi_reduction <add>, %239, %cst_70 [1] : vector<16x32xf32> to vector<16xf32>
    %241 = vector.shape_cast %240 : vector<16xf32> to vector<16x1xf32>
    %cst_71 = arith.constant 3.200000e+01 : f32
    %242 = vector.broadcast %cst_71 : f32 to vector<16x1xf32>
    %243 = arith.divf %241, %242 : vector<16x1xf32>
    %244 = vector.broadcast %243 : vector<16x1xf32> to vector<16x32xf32>
    %245 = arith.subf %239, %244 : vector<16x32xf32>
    %246 = arith.mulf %245, %245 : vector<16x32xf32>
    %cst_72 = arith.constant dense<0.000000e+00> : vector<16xf32>
    %247 = vector.multi_reduction <add>, %246, %cst_72 [1] : vector<16x32xf32> to vector<16xf32>
    %248 = vector.shape_cast %247 : vector<16xf32> to vector<16x1xf32>
    %cst_73 = arith.constant 3.200000e+01 : f32
    %249 = vector.broadcast %cst_73 : f32 to vector<16x1xf32>
    %250 = arith.divf %248, %249 : vector<16x1xf32>
    %251 = vector.broadcast %243 : vector<16x1xf32> to vector<16x32xf32>
    %252 = arith.subf %239, %251 : vector<16x32xf32>
    %cst_74 = arith.constant 9.99999996E-13 : f32
    %253 = vector.broadcast %cst_74 : f32 to vector<16x1xf32>
    %254 = arith.addf %250, %253 : vector<16x1xf32>
    %255 = math.rsqrt %254 : vector<16x1xf32>
    %256 = vector.broadcast %255 : vector<16x1xf32> to vector<16x32xf32>
    %257 = arith.mulf %252, %256 : vector<16x32xf32>
    %258 = vector.broadcast %140 : vector<1x32xf32> to vector<16x32xf32>
    %259 = arith.mulf %257, %258 : vector<16x32xf32>
    %260 = vector.broadcast %141 : vector<1x32xf32> to vector<16x32xf32>
    %261 = arith.addf %259, %260 : vector<16x32xf32>
    %262 = vector.extract_strided_slice %261 {offsets = [0, 0], sizes = [1, 32], strides = [1, 1]} : vector<16x32xf32> to vector<1x32xf32>
    %263 = vector.extract_strided_slice %261 {offsets = [8, 0], sizes = [1, 32], strides = [1, 1]} : vector<16x32xf32> to vector<1x32xf32>
    %264 = tpu.concatenate %262, %263 in 0 : vector<1x32xf32>, vector<1x32xf32> -> vector<2x32xf32>
    %c0_75 = arith.constant 0 : index
    %c0_76 = arith.constant 0 : index
    %265 = vector.load %arg7[%c0_75, %c0_76] : memref<32x128xbf16, #tpu.memory_space<vmem>>, vector<32x128xbf16>
    %266 = arith.truncf %264 : vector<2x32xf32> to vector<2x32xbf16>
    %cst_77 = arith.constant dense<0.000000e+00> : vector<2x128xf32>
    %267 = tpu.matmul %266, %265, %cst_77 {dimension_numbers = #tpu.dot_dimension_numbers<[1], [0], [0], [1], [0, 0, 1, 1], [], []>} : vector<2x32xbf16>, vector<32x128xbf16>, vector<2x128xf32> -> vector<2x128xf32>
    %c0_78 = arith.constant 0 : index
    %c0_79 = arith.constant 0 : index
    %268 = vector.load %arg9[%c0_78, %c0_79] : memref<2x128xf32, #tpu.memory_space<vmem>>, vector<1x128xf32>
    %269 = vector.broadcast %268 : vector<1x128xf32> to vector<2x128xf32>
    %270 = arith.addf %267, %269 : vector<2x128xf32>
    %271 = math.tanh %270 : vector<2x128xf32>
    %c0_80 = arith.constant 0 : index
    %c0_81 = arith.constant 0 : index
    %272 = vector.load %arg8[%c0_80, %c0_81] : memref<128x128xbf16, #tpu.memory_space<vmem>>, vector<128x128xbf16>
    %273 = arith.truncf %271 : vector<2x128xf32> to vector<2x128xbf16>
    %cst_82 = arith.constant dense<0.000000e+00> : vector<2x128xf32>
    %274 = tpu.matmul %273, %272, %cst_82 {dimension_numbers = #tpu.dot_dimension_numbers<[1], [0], [0], [1], [0, 0, 1, 1], [], []>} : vector<2x128xbf16>, vector<128x128xbf16>, vector<2x128xf32> -> vector<2x128xf32>
    %c1_83 = arith.constant 1 : index
    %c0_84 = arith.constant 0 : index
    %275 = vector.load %arg9[%c1_83, %c0_84] : memref<2x128xf32, #tpu.memory_space<vmem>>, vector<1x128xf32>
    %276 = vector.broadcast %275 : vector<1x128xf32> to vector<2x128xf32>
    %277 = arith.addf %274, %276 : vector<2x128xf32>
    %c0_85 = arith.constant 0 : index
    %c0_86 = arith.constant 0 : index
    %278 = vector.load %arg10[%c0_85, %c0_86] : memref<2x128xf32, #tpu.memory_space<vmem>>, vector<2x128xf32>
    tpu.vector_store %arg10[%c0_85, %c0_86], %277 {strides = array<i32>} : memref<2x128xf32, #tpu.memory_space<vmem>>, vector<2x128xf32>,
    return
  }
}

</mosaic_0001>

<bundles_post_ra>
// kernel: intent_classifier_forward.1
= control target key start
LH: loop header
LB: loop body
LE: loop exit
PB: predicated region body
PF: predicated region fallthrough
CT: control target
= control target key end

     0   :  { %s2253_s0 = inlined_call_operand.vmem [shape: f32[16,32], index: 0, kind: input, shape index: {}]   ;;  %s2254_s1 = inlined_call_operand.vmem [shape: f32[64,64], index: 1, kind: input, shape index: {}]   ;;  %s2255_s2 = inlined_call_operand.vmem [shape: bf16[2,32,96], index: 2, kind: input, shape index: {}]   ;;  %s2256_s3 = inlined_call_operand.vmem [shape: bf16[2,32,32], index: 3, kind: input, shape index: {}]   ;;  %s2257_s4 = inlined_call_operand.vmem [shape: bf16[2,32,128], index: 4, kind: input, shape index: {}]   ;;  %s2258_s5 = inlined_call_operand.vmem [shape: bf16[2,128,32], index: 5, kind: input, shape index: {}]   ;;  %s2259_s6 = inlined_call_operand.vmem [shape: f32[2,8,128], index: 6, kind: input, shape index: {}]   ;;  %s2260_s7 = inlined_call_operand.vmem [shape: bf16[32,128], index: 7, kind: input, shape index: {}]   ;;  %s2261_s8 = inlined_call_operand.vmem [shape: bf16[128,128], index: 8, kind: input, shape index: {}]   ;;  %s2262_s9 = inlined_call_operand.vmem [shape: f32[2,128], index: 9, kind: input, shape index: {}]   ;;  %s2263_s10 = inlined_call_operand.hbm [shape: f32[2,128], index: 10, kind: output, shape index: {}]  }
   0x1   :  { %v1551_v0 = vld [vmem:[%s2255_s2 + $0x8] sm:$0xff]  ;;  %v1550_v1 = vld [vmem:[%s2255_s2] sm:$0xff] }
   0x2   :  { %v1852_v2 = vld [vmem:[%s2253_s0] sm:$0xff]  ;;  %76 = vmatpush.bf16.msra.mxu0 %v1551_v0  ;;  %v1857_v3 = vld [vmem:[%s2253_s0 + $0x8] sm:$0xff] }
   0x3   :  { %15 = vsyncpa [#allocation3], 0  ;;  %v52_v4 = vpack.c.bf16 %v1857_v3, %v1852_v2  ;;  %vm66_vm0 = vcmask 261120   ;;  %v1865_v6 = vld [vmem:[%s2259_s6] sm:$0xff]  ;;  %s1778_s0 = smov 120   ;;  %s1779_s23 = smov 104  }
   0x4   :  { %v53_v7 = vperm.slane %v1865_v6, 0  ;;  %s1780_s24 = smov 112   ;;  %s1781_s25 = smov 96   ;;  %vm120_vm1 = vcmask 64512   ;;  %v1899_v34 = vld [vmem:[%s2254_s1] sm:$0xff]  ;;  %vm174_vm2 = vcmask 523264  }
   0x5   :  { %s1782_s26 = smov 64   ;;  %v1906_v38 = vld [vmem:[%s2254_s1 + $0x8] sm:$0xff]  ;;  %v1913_v42 = vld [vmem:[%s2254_s1 + $0x10] sm:$0xff]  ;;  %v1920_v46 = vld [vmem:[%s2254_s1 + $0x18] sm:$0xff]  ;;  %s1784_s27 = smov 16   ;;  %vm346_vm3 = vcmask 130048  }
   0x6   :  { %77 = vmatpush.bf16.msra.mxu0 %v1550_v1  ;;  %v1927_v50 = vld [vmem:[%s2254_s1 + $0x20] sm:$0xff]  ;;  %v1934_v54 = vld [vmem:[%s2254_s1 + $0x28] sm:$0xff]  ;;  %v1941_v58 = vld [vmem:[%s2254_s1 + $0x30] sm:$0xff]  ;;  %s1785_s28 = smov 24   ;;  %vm349_vm4 = vcmask 195584   ;;  %s1787_s19 = smov [#allocation2]  }
   0x7   :  { %v1948_v62 = vld [vmem:[%s2254_s1 + $0x38] sm:$0xff]  ;;  %s1783_s1 = smov 8   ;;  %s1335_s20 = sshll.u32 %s1787_s19, 4  ;;  %s1336_s20 = int_to_ptr.vmem [resolvable:$true] %s1335_s20 }
   0x8   :  { %s1337_s22 = sshll.u32 %s2263_s10, 4  ;;  %s1338_s22 = int_to_ptr.hbm [resolvable:$true] %s1337_s22 }
   0x9   :  { %1354 = vmatmul.msk.bf16.vlgmr.msra.gmra.mxu0 %vm66_vm0, %v52_v4 }
  0x86   :  { %v79_v5 = vpop.f32.mrf.mxu0 }
  0x87   :  { %v80_v9 = vadd.f32 %v79_v5, %v53_v7 }
  0x8e   :  { %v81_v8 = vpop.f32.mrf.mxu0 }
  0x8f   :  { %v82_v10 = vadd.f32 %v81_v8, %v53_v7 }
  0x91   :  { %v1608_v11 = vpack.i.bf16 %v82_v10, %v80_v9  ;;  %v1871_v12 = vpack.c.bf16 %v82_v10, %v80_v9 }
  0x93   :  { %1609 = vrot.lane.b32.xlu1 %v1608_v11, %s1778_s0  ;;  %1599 = vrot.lane.b32.xlu0 %v1608_v11, %s1779_s23 }
  0x9b   :  { %1604 = vrot.lane.b32.xlu0 %v1608_v11, %s1780_s24 }
  0xa3   :  { %112 = vrot.lane.b32.xlu0 %v1871_v12, %s1781_s25 }
 0x105   :  { %v1600_v13 = vpop.permute.xlu0 %1599  ;;  %v1610_v21 = vpop.permute.xlu1 %1609 }
 0x106   :  { %v1602_v14 = vunpack.i.h.bf16 %v1600_v13  ;;  %v1601_v15 = vunpack.i.l.bf16 %v1600_v13  ;;  %v1612_v22 = vunpack.i.h.bf16 %v1610_v21  ;;  %v1611_v23 = vunpack.i.l.bf16 %v1610_v21 }
 0x108   :  { %v107_v16 = vpack.c.bf16 %v1602_v14, %v1601_v15  ;;  %v1880_v24 = vpack.c.bf16 %v1612_v22, %v1611_v23 }
 0x10a   :  { %118 = vrot.lane.b32.xlu1 %v107_v16, %s1781_s25 }
 0x10d   :  { %v1605_v17 = vpop.permute.xlu0 %1604 }
 0x10e   :  { %v1607_v18 = vunpack.i.h.bf16 %v1605_v17  ;;  %v1606_v19 = vunpack.i.l.bf16 %v1605_v17 }
 0x110   :  { %v1876_v20 = vpack.c.bf16 %v1607_v18, %v1606_v19 }
 0x112   :  { %116 = vrot.lane.b32.xlu2 %v1876_v20, %s1781_s25 }
 0x115   :  { %v113_v32 = vpop.permute.xlu0 %112 }
 0x116   :  { %v134_v33 = vsel %vm120_vm1, %v113_v32, 0 }
 0x11a   :  { %114 = vrot.lane.b32.xlu2 %v1880_v24, %s1781_s25 }
 0x122   :  { %273 = vrot.lane.b32.xlu2 %v107_v16, %s1782_s26 }
 0x16c   :  { %v117_v25 = vpop.permute.xlu2 %116 }
 0x16d   :  { %v140_v30 = vsel %vm120_vm1, %v117_v25, 0 }
 0x174   :  { %v115_v26 = vpop.permute.xlu2 %114 }
 0x175   :  { %v137_v31 = vsel %vm120_vm1, %v115_v26, 0 }
 0x17c   :  { %v274_v27 = vpop.permute.xlu2 %273  ;;  %v119_v28 = vpop.permute.xlu1 %118 }
 0x17d   :  { %295 = vmatpush.bf16.msra.mxu2 %v274_v27  ;;  %v143_v29 = vsel %vm120_vm1, %v119_v28, 0 }
 0x17e   :  { %149 = vmatpush.bf16.xpose.msra.mxu1 %v143_v29 }
 0x186   :  { %150 = vmatpush.bf16.xpose.msra.mxu1 %v140_v30 }
 0x18e   :  { %151 = vmatpush.bf16.xpose.msra.mxu1 %v137_v31 }
 0x196   :  { %152 = vmatpush.bf16.xpose.msra.mxu1 %v134_v33 }
 0x19d   :  { %1355 = vmatmul.msk.bf16.vlgmr.msra.gmra.mxu1 %vm120_vm1, %v1871_v12 }
 0x1ad   :  { %1356 = vmatmul.msk.bf16.gmra.mxu1 %vm120_vm1, %v1880_v24 }
 0x1bd   :  { %1357 = vmatmul.msk.bf16.gmra.mxu1 %vm120_vm1, %v1876_v20 }
 0x1cd   :  { %1358 = vmatmul.msk.bf16.gmra.mxu1 %vm120_vm1, %v107_v16 }
 0x21a   :  { %v154_v35 = vpop.f32.mrf.mxu1 }
 0x21b   :  { %v155_v36 = vadd.f32 %v154_v35, %v1899_v34 }
 0x21d   :  { %v175_v37 = vsel %vm174_vm2, %v155_v36, -inf }
 0x21e   :  { %176 = vmax.xlane.f32.xlu1 %v175_v37 }
 0x222   :  { %v156_v39 = vpop.f32.mrf.mxu1 }
 0x223   :  { %v157_v40 = vadd.f32 %v156_v39, %v1906_v38 }
 0x225   :  { %v178_v41 = vsel %vm174_vm2, %v157_v40, -inf }
 0x226   :  { %179 = vmax.xlane.f32.xlu2 %v178_v41 }
 0x22a   :  { %v159_v43 = vpop.f32.mrf.mxu1 }
 0x22b   :  { %v160_v44 = vadd.f32 %v159_v43, %v1913_v42 }
 0x22d   :  { %v181_v45 = vsel %vm174_vm2, %v160_v44, -inf }
 0x22e   :  { %182 = vmax.xlane.f32.xlu0 %v181_v45 }
 0x232   :  { %v161_v47 = vpop.f32.mrf.mxu1 }
 0x233   :  { %v162_v48 = vadd.f32 %v161_v47, %v1920_v46 }
 0x235   :  { %v184_v49 = vsel %vm174_vm2, %v162_v48, -inf }
 0x236   :  { %185 = vmax.xlane.f32.xlu2 %v184_v49 }
 0x23a   :  { %v164_v51 = vpop.f32.mrf.mxu1 }
 0x23b   :  { %v165_v52 = vadd.f32 %v164_v51, %v1927_v50 }
 0x23d   :  { %v187_v53 = vsel %vm174_vm2, %v165_v52, -inf }
 0x23e   :  { %188 = vmax.xlane.f32.xlu1 %v187_v53 }
 0x242   :  { %v166_v55 = vpop.f32.mrf.mxu1 }
 0x243   :  { %v167_v56 = vadd.f32 %v166_v55, %v1934_v54 }
 0x245   :  { %v190_v57 = vsel %vm174_vm2, %v167_v56, -inf }
 0x246   :  { %191 = vmax.xlane.f32.xlu2 %v190_v57 }
 0x24a   :  { %v169_v59 = vpop.f32.mrf.mxu1 }
 0x24b   :  { %v170_v60 = vadd.f32 %v169_v59, %v1941_v58 }
 0x24d   :  { %v193_v61 = vsel %vm174_vm2, %v170_v60, -inf }
 0x24e   :  { %194 = vmax.xlane.f32.xlu0 %v193_v61 }
 0x252   :  { %v171_v63 = vpop.f32.mrf.mxu1 }
 0x253   :  { %v172_v0 = vadd.f32 %v171_v63, %v1948_v62 }
 0x255   :  { %v196_v1 = vsel %vm174_vm2, %v172_v0, -inf }
 0x256   :  { %197 = vmax.xlane.f32.xlu1 %v196_v1 }
 0x25e   :  { %267 = vrot.lane.b32.xlu2 %v1871_v12, %s1782_s26 }
 0x291   :  { %v177_v4 = vpop.xlane.xlu1 %176 }
 0x292   :  { %v199_v5 = vsub.f32 %v155_v36, %v177_v4 }
 0x294   :  { %v207_v7 = vmul.f32 1.442695, %v199_v5 }
 0x296   :  { %1660 = vpow2.f32 %v207_v7 }
 0x299   :  { %v180_v8 = vpop.xlane.xlu2 %179 }
 0x29a   :  { %v200_v9 = vsub.f32 %v157_v40, %v180_v8 }
 0x29c   :  { %v1954_v10 = vpop.eup %1660  ;;  %v209_v11 = vmul.f32 1.442695, %v200_v9 }
 0x29d   :  { %v223_v13 = vsel %vm174_vm2, %v1954_v10, 0.0 }
 0x29e   :  { %1662 = vpow2.f32 %v209_v11  ;;  %224 = vadd.xlane.f32.xlu0 %v223_v13 }
 0x2a1   :  { %v183_v21 = vpop.xlane.xlu0 %182 }
 0x2a2   :  { %v201_v26 = vsub.f32 %v160_v44, %v183_v21 }
 0x2a4   :  { %v1663_v14 = vpop.eup %1662  ;;  %v211_v29 = vmul.f32 1.442695, %v201_v26 }
 0x2a5   :  { %v226_v15 = vsel %vm174_vm2, %v1663_v14, 0.0 }
 0x2a6   :  { %227 = vadd.xlane.f32.xlu1 %v226_v15 }
 0x2a9   :  { %v186_v16 = vpop.xlane.xlu2 %185 }
 0x2aa   :  { %v202_v12 = vsub.f32 %v162_v48, %v186_v16 }
 0x2ac   :  { %v213_v17 = vmul.f32 1.442695, %v202_v12 }
 0x2ae   :  { %1664 = vpow2.f32 %v213_v17 }
 0x2b1   :  { %v189_v31 = vpop.xlane.xlu1 %188 }
 0x2b2   :  { %271 = vrot.lane.b32.xlu0 %v1876_v20, %s1782_s26  ;;  %v203_v33 = vsub.f32 %v165_v52, %v189_v31 }
 0x2b4   :  { %v1665_v18 = vpop.eup %1664 }
 0x2b5   :  { %v232_v19 = vsel %vm174_vm2, %v1665_v18, 0.0 }
 0x2b6   :  { %233 = vadd.xlane.f32.xlu2 %v232_v19 }
 0x2b9   :  { %v192_v20 = vpop.xlane.xlu2 %191 }
 0x2ba   :  { %v204_v30 = vsub.f32 %v167_v56, %v192_v20 }
 0x2bc   :  { %v217_v32 = vmul.f32 1.442695, %v204_v30 }
 0x2bf   :  { %269 = vrot.lane.b32.xlu1 %v1880_v24, %s1782_s26  ;;  %v215_v24 = vmul.f32 1.442695, %v203_v33 }
 0x2c1   :  { %v195_v22 = vpop.xlane.xlu0 %194  ;;  %v268_v59 = vpop.permute.xlu2 %267 }
 0x2c2   :  { %v205_v23 = vsub.f32 %v170_v60, %v195_v22 }
 0x2c4   :  { %v219_v25 = vmul.f32 1.442695, %v205_v23 }
 0x2c6   :  { %1666 = vpow2.f32 %v219_v25 }
 0x2c7   :  { %1668 = vpow2.f32 %v211_v29 }
 0x2c8   :  { %1670 = vpow2.f32 %v217_v32 }
 0x2c9   :  { %v198_v37 = vpop.xlane.xlu1 %197  ;;  %1672 = vpow2.f32 %v215_v24  ;;  %v1553_v24 = vld [vmem:[%s2256_s3 + $0x8] sm:$0xff] }
 0x2ca   :  { %v206_v39 = vsub.f32 %v172_v0, %v198_v37  ;;  %379 = vmatpush.bf16.msra.mxu3 %v1553_v24 }
 0x2cc   :  { %v1964_v27 = vpop.eup %1666  ;;  %v221_v41 = vmul.f32 1.442695, %v206_v39 }
 0x2cd   :  { %v241_v28 = vsel %vm174_vm2, %v1964_v27, 0.0  ;;  %v1669_v35 = vpop.eup %1668 }
 0x2ce   :  { %242 = vadd.xlane.f32.xlu2 %v241_v28  ;;  %v229_v36 = vsel %vm174_vm2, %v1669_v35, 0.0  ;;  %v1671_v40 = vpop.eup %1670  ;;  %1674 = vpow2.f32 %v221_v41 }
 0x2cf   :  { %v238_v43 = vsel %vm174_vm2, %v1671_v40, 0.0  ;;  %v1673_v44 = vpop.eup %1672 }
 0x2d0   :  { %v235_v45 = vsel %vm174_vm2, %v1673_v44, 0.0 }
 0x2d4   :  { %v1675_v47 = vpop.eup %1674 }
 0x2d5   :  { %v244_v48 = vsel %vm174_vm2, %v1675_v47, 0.0 }
 0x2dc   :  { %230 = vadd.xlane.f32.xlu0 %v229_v36  ;;  %v1552_v36 = vld [vmem:[%s2256_s3] sm:$0xff] }
 0x2dd   :  { %380 = vmatpush.bf16.msra.mxu3 %v1552_v36 }
 0x2e4   :  { %239 = vadd.xlane.f32.xlu0 %v238_v43 }
 0x2e9   :  { %236 = vadd.xlane.f32.xlu1 %v235_v45 }
 0x2f1   :  { %245 = vadd.xlane.f32.xlu1 %v244_v48 }
 0x311   :  { %v225_v49 = vpop.xlane.xlu0 %224 }
 0x319   :  { %v228_v52 = vpop.xlane.xlu1 %227 }
 0x31a   :  { %1676 = vrcp.f32 %v228_v52 }
 0x31b   :  { %1678 = vrcp.f32 %v225_v49 }
 0x320   :  { %v1677_v53 = vpop.eup %1676 }
 0x321   :  { %v1679_v56 = vpop.eup %1678  ;;  %v256_v57 = vmul.f32 %v1677_v53, %v1663_v14 }
 0x322   :  { %v255_v60 = vmul.f32 %v1679_v56, %v1954_v10 }
 0x324   :  { %v272_v51 = vpop.permute.xlu0 %271  ;;  %v263_v61 = vpack.c.bf16 %v256_v57, %v255_v60 }
 0x325   :  { %296 = vmatpush.bf16.msra.mxu2 %v272_v51 }
 0x329   :  { %v234_v63 = vpop.xlane.xlu2 %233 }
 0x32a   :  { %1680 = vrcp.f32 %v234_v63 }
 0x330   :  { %v1681_v1 = vpop.eup %1680 }
 0x331   :  { %v270_v55 = vpop.permute.xlu1 %269  ;;  %v258_v7 = vmul.f32 %v1681_v1, %v1665_v18 }
 0x332   :  { %297 = vmatpush.bf16.msra.mxu2 %v270_v55 }
 0x336   :  { %298 = vmatpush.bf16.msra.mxu2 %v268_v59  ;;  %v357_v59 = vperm.slane %v1865_v6, 1 }
 0x339   :  { %1359 = vmatmul.msk.bf16.vlgmr.msra.gmra.mxu2 %vm174_vm2, %v263_v61 }
 0x341   :  { %v243_v17 = vpop.xlane.xlu2 %242 }
 0x34f   :  { %v231_v0 = vpop.xlane.xlu0 %230 }
 0x350   :  { %1682 = vrcp.f32 %v231_v0 }
 0x356   :  { %v1683_v4 = vpop.eup %1682 }
 0x357   :  { %v257_v5 = vmul.f32 %v1683_v4, %v1669_v35  ;;  %v240_v9 = vpop.xlane.xlu0 %239 }
 0x359   :  { %v264_v8 = vpack.c.bf16 %v258_v7, %v257_v5 }
 0x35b   :  { %1360 = vmatmul.msk.bf16.gmra.mxu2 %vm174_vm2, %v264_v8  ;;  %v1786_v8 = vmov 32.0  }
 0x35c   :  { %v237_v11 = vpop.xlane.xlu1 %236 }
 0x35d   :  { %1684 = vrcp.f32 %v237_v11 }
 0x35e   :  { %1686 = vrcp.f32 %v240_v9 }
 0x363   :  { %v1685_v10 = vpop.eup %1684 }
 0x364   :  { %v1687_v13 = vpop.eup %1686  ;;  %v259_v14 = vmul.f32 %v1685_v10, %v1673_v44  ;;  %v246_v16 = vpop.xlane.xlu1 %245 }
 0x365   :  { %v260_v15 = vmul.f32 %v1687_v13, %v1671_v40  ;;  %1688 = vrcp.f32 %v246_v16 }
 0x366   :  { %1690 = vrcp.f32 %v243_v17 }
 0x367   :  { %v265_v12 = vpack.c.bf16 %v260_v15, %v259_v14  ;;  %1692 = vrcp.f32 %v1786_v8  ;;  %v1556_v8 = vld [vmem:[%s2258_s5] sm:$0xff] }
 0x36b   :  { %1361 = vmatmul.msk.bf16.gmra.mxu2 %vm174_vm2, %v265_v12  ;;  %v1689_v19 = vpop.eup %1688 }
 0x36c   :  { %v1691_v18 = vpop.eup %1690  ;;  %v262_v21 = vmul.f32 %v1689_v19, %v1675_v47 }
 0x36d   :  { %v261_v22 = vmul.f32 %v1691_v18, %v1964_v27  ;;  %v1693_v9 = vpop.eup %1692 }
 0x36e   :  { %v396_v11 = vmul.f32 32.0, %v1693_v9  ;;  %vm400_vm5 = vweird.f32 %v1693_v9 }
 0x36f   :  { %v266_v23 = vpack.c.bf16 %v262_v21, %v261_v22 }
 0x370   :  { %v397_v10 = vsub.f32 1.0, %v396_v11 }
 0x372   :  { %v398_v13 = vmul.f32 %v1693_v9, %v397_v10 }
 0x374   :  { %v399_v14 = vadd.f32 %v1693_v9, %v398_v13 }
 0x376   :  { %v1999_v15 = vsel %vm400_vm5, %v1693_v9, %v399_v14  ;;  %v451_v9 = vperm.slane %v1865_v6, 4 }
 0x37b   :  { %1362 = vmatmul.msk.bf16.gmra.mxu2 %vm174_vm2, %v266_v23 }
 0x3bc   :  { %v300_v25 = vpop.f32.mrf.mxu2 }
 0x3c4   :  { %v302_v26 = vpop.f32.mrf.mxu2 }
 0x3de   :  { %v305_v28 = vpop.f32.mrf.mxu2 }
 0x3e6   :  { %v307_v29 = vpop.f32.mrf.mxu2 }
 0x3e7   :  { %v1613_v20 = vpack.i.bf16 %v307_v29, %v305_v28  ;;  %v1554_v28 = vld [vmem:[%s2257_s4] sm:$0xff] }
 0x3e9   :  { %1614 = vrot.lane.b32.xlu0 %v1613_v20, %s1783_s1 }
 0x3ee   :  { %v310_v30 = vpop.f32.mrf.mxu2 }
 0x3f6   :  { %v312_v31 = vpop.f32.mrf.mxu2 }
 0x3f7   :  { %v1618_v32 = vpack.i.bf16 %v312_v31, %v310_v30 }
 0x3f9   :  { %1619 = vrot.lane.b32.xlu2 %v1618_v32, %s1784_s27 }
 0x3fe   :  { %v315_v33 = vpop.f32.mrf.mxu2 }
 0x406   :  { %v317_v35 = vpop.f32.mrf.mxu2 }
 0x407   :  { %v1623_v27 = vpack.i.bf16 %v317_v35, %v315_v33 }
 0x409   :  { %1624 = vrot.lane.b32.xlu1 %v1623_v27, %s1785_s28 }
 0x453   :  { %v1620_v41 = vpop.permute.xlu2 %1619 }
 0x454   :  { %v1622_v45 = vunpack.i.h.bf16 %v1620_v41  ;;  %v1621_v47 = vunpack.i.l.bf16 %v1620_v41 }
 0x45b   :  { %v1615_v37 = vpop.permute.xlu0 %1614 }
 0x45c   :  { %v1617_v39 = vunpack.i.h.bf16 %v1615_v37  ;;  %v1616_v40 = vunpack.i.l.bf16 %v1615_v37 }
 0x45e   :  { %v345_v43 = vsel %vm120_vm1, %v302_v26, %v1617_v39  ;;  %v344_v44 = vsel %vm120_vm1, %v300_v25, %v1616_v40  ;;  %v1555_v25 = vld [vmem:[%s2257_s4 + $0x8] sm:$0xff] }
 0x45f   :  { %v347_v52 = vsel %vm346_vm3, %v344_v44, %v1621_v47  ;;  %v348_v53 = vsel %vm346_vm3, %v345_v43, %v1622_v45  ;;  %473 = vmatpush.bf16.msrb.mxu0 %v1555_v25 }
 0x463   :  { %474 = vmatpush.bf16.msrb.mxu0 %v1554_v28 }
 0x47b   :  { %v1625_v48 = vpop.permute.xlu1 %1624 }
 0x47c   :  { %v1627_v49 = vunpack.i.h.bf16 %v1625_v48  ;;  %v1626_v51 = vunpack.i.l.bf16 %v1625_v48  ;;  %v440_v48 = vperm.slane %v1865_v6, 2 }
 0x47e   :  { %v350_v55 = vsel %vm349_vm4, %v347_v52, %v1626_v51  ;;  %v351_v56 = vsel %vm349_vm4, %v348_v53, %v1627_v49 }
 0x47f   :  { %v356_v57 = vpack.c.bf16 %v351_v56, %v350_v55  ;;  %v443_v55 = vperm.slane %v1865_v6, 3 }
 0x481   :  { %1371 = vmatmul.msk.bf16.vlgmr.msra.gmra.mxu3 %vm66_vm0, %v356_v57 }
 0x504   :  { %v382_v60 = vpop.f32.mrf.mxu3 }
 0x505   :  { %v383_v61 = vadd.f32 %v382_v60, %v357_v59 }
 0x507   :  { %v387_v63 = vadd.f32 %v383_v61, %v1852_v2  ;;  %v1563_v61 = vld [vmem:[%s2258_s5 + $0x38] sm:$0xff] }
 0x508   :  { %565 = vmatpush.bf16.msrb.mxu3 %v1563_v61  ;;  %v1564_v61 = vld [vmem:[%s2255_s2 + $0x10] sm:$0xff] }
 0x509   :  { %v389_v0 = vsel %vm66_vm0, %v387_v63, 0.0 }
 0x50a   :  { %390 = vadd.xlane.f32.xlu0 %v389_v0  ;;  %v1561_v0 = vld [vmem:[%s2258_s5 + $0x28] sm:$0xff] }
 0x50c   :  { %v384_v1 = vpop.f32.mrf.mxu3 }
 0x50d   :  { %v385_v4 = vadd.f32 %v384_v1, %v357_v59  ;;  %v1560_v1 = vld [vmem:[%s2258_s5 + $0x20] sm:$0xff] }
 0x50f   :  { %v388_v5 = vadd.f32 %v385_v4, %v1857_v3  ;;  %v1559_v4 = vld [vmem:[%s2258_s5 + $0x18] sm:$0xff] }
 0x511   :  { %v392_v7 = vsel %vm66_vm0, %v388_v5, 0.0 }
 0x512   :  { %393 = vadd.xlane.f32.xlu2 %v392_v7  ;;  %v1557_v7 = vld [vmem:[%s2258_s5 + $0x8] sm:$0xff] }
 0x57d   :  { %v391_v2 = vpop.xlane.xlu0 %390 }
 0x57e   :  { %v402_v16 = vmul.f32 %v1999_v15, %v391_v2 }
 0x580   :  { %v404_v12 = vsub.f32 %v387_v63, %v402_v16  ;;  %v1562_v63 = vld [vmem:[%s2258_s5 + $0x30] sm:$0xff] }
 0x581   :  { %566 = vmatpush.bf16.msrb.mxu3 %v1562_v63 }
 0x582   :  { %v406_v17 = vmul.f32 %v404_v12, %v404_v12 }
 0x584   :  { %v408_v3 = vsel %vm66_vm0, %v406_v17, 0.0 }
 0x585   :  { %v394_v19 = vpop.xlane.xlu2 %393  ;;  %409 = vadd.xlane.f32.xlu1 %v408_v3  ;;  %567 = vmatpush.bf16.msrb.mxu3 %v1561_v0 }
 0x586   :  { %v403_v18 = vmul.f32 %v1999_v15, %v394_v19 }
 0x588   :  { %v405_v21 = vsub.f32 %v388_v5, %v403_v18  ;;  %v1558_v5 = vld [vmem:[%s2258_s5 + $0x10] sm:$0xff] }
 0x589   :  { %568 = vmatpush.bf16.msrb.mxu3 %v1560_v1 }
 0x58a   :  { %v407_v22 = vmul.f32 %v405_v21, %v405_v21 }
 0x58c   :  { %v411_v23 = vsel %vm66_vm0, %v407_v22, 0.0 }
 0x58d   :  { %412 = vadd.xlane.f32.xlu0 %v411_v23  ;;  %569 = vmatpush.bf16.msrb.mxu3 %v1559_v4 }
 0x591   :  { %570 = vmatpush.bf16.msrb.mxu3 %v1558_v5 }
 0x595   :  { %571 = vmatpush.bf16.msrb.mxu3 %v1557_v7 }
 0x599   :  { %572 = vmatpush.bf16.msrb.mxu3 %v1556_v8 }
 0x5f8   :  { %v410_v26 = vpop.xlane.xlu1 %409 }
 0x5f9   :  { %v414_v29 = vmul.f32 %v410_v26, %v1999_v15 }
 0x5fb   :  { %v416_v20 = vadd.f32 1e-12, %v414_v29 }
 0x5fd   :  { %1694 = vrsqrt.f32 %v416_v20  ;;  %vm424_vm7 = vweird.f32 %v416_v20 }
 0x600   :  { %v413_v30 = vpop.xlane.xlu0 %412 }
 0x601   :  { %v415_v31 = vmul.f32 %v413_v30, %v1999_v15 }
 0x603   :  { %v1695_v32 = vpop.eup %1694  ;;  %v417_v33 = vadd.f32 1e-12, %v415_v31 }
 0x604   :  { %v419_v35 = vmul.f32 %v1695_v32, %v416_v20  ;;  %vm425_vm6 = vweird.f32 %v1695_v32 }
 0x605   :  { %1696 = vrsqrt.f32 %v417_v33  ;;  %vm426_vm8 = vmor %vm424_vm7, %vm425_vm6  ;;  %vm434_vm10 = vweird.f32 %v417_v33 }
 0x606   :  { %v420_v27 = vmul.f32 %v1695_v32, %v419_v35  ;;  %v516_v35 = vperm.slane %v1865_v6, 5 }
 0x608   :  { %v421_v24 = vmul.f32 0.5, %v420_v27 }
 0x60a   :  { %v422_v36 = vsub.f32 1.5, %v421_v24 }
 0x60b   :  { %v1697_v37 = vpop.eup %1696 }
 0x60c   :  { %v423_v39 = vmul.f32 %v1695_v32, %v422_v36  ;;  %v429_v40 = vmul.f32 %v1697_v37, %v417_v33  ;;  %vm435_vm9 = vweird.f32 %v1697_v37 }
 0x60d   :  { %vm436_vm11 = vmor %vm434_vm10, %vm435_vm9 }
 0x60e   :  { %v430_v41 = vmul.f32 %v1697_v37, %v429_v40  ;;  %v427_v43 = vsel %vm426_vm8, %v1695_v32, %v423_v39 }
 0x60f   :  { %v438_v47 = vmul.f32 %v427_v43, %v404_v12 }
 0x610   :  { %v431_v44 = vmul.f32 0.5, %v430_v41 }
 0x611   :  { %v441_v53 = vmul.f32 %v440_v48, %v438_v47 }
 0x612   :  { %v432_v45 = vsub.f32 1.5, %v431_v44 }
 0x613   :  { %v444_v57 = vadd.f32 %v443_v55, %v441_v53 }
 0x614   :  { %v433_v49 = vmul.f32 %v1697_v37, %v432_v45 }
 0x616   :  { %v437_v51 = vsel %vm436_vm11, %v1697_v37, %v433_v49 }
 0x617   :  { %v439_v52 = vmul.f32 %v437_v51, %v405_v21 }
 0x619   :  { %v442_v56 = vmul.f32 %v440_v48, %v439_v52 }
 0x61b   :  { %v445_v59 = vadd.f32 %v443_v55, %v442_v56 }
 0x61d   :  { %v450_v60 = vpack.c.bf16 %v445_v59, %v444_v57 }
 0x61f   :  { %1380 = vmatmul.msk.bf16.vlgmr.msrb.gmra.mxu0 %vm66_vm0, %v450_v60 }
 0x69c   :  { %v476_v11 = vpop.f32.mrf.mxu0 }
 0x69d   :  { %v477_v10 = vadd.f32 %v476_v11, %v451_v9 }
 0x69f   :  { %v483_v13 = vmul.f32 0.044715, %v477_v10  ;;  %v481_v29 = vmul.f32 0.5, %v477_v10 }
 0x6a1   :  { %v485_v14 = vmul.f32 %v483_v13, %v477_v10 }
 0x6a3   :  { %v487_v2 = vmul.f32 %v485_v14, %v477_v10 }
 0x6a4   :  { %v478_v16 = vpop.f32.mrf.mxu0 }
 0x6a5   :  { %v479_v12 = vadd.f32 %v478_v16, %v451_v9  ;;  %v489_v17 = vadd.f32 %v487_v2, %v477_v10 }
 0x6a7   :  { %v484_v3 = vmul.f32 0.044715, %v479_v12  ;;  %v491_v18 = vmul.f32 0.7978846, %v489_v17  ;;  %v482_v20 = vmul.f32 0.5, %v479_v12 }
 0x6a9   :  { %v486_v19 = vmul.f32 %v484_v3, %v479_v12  ;;  %1698 = vtanh.f32 %v491_v18  ;;  %v625_v3 = vperm.slane %v1865_v6, 6 }
 0x6ab   :  { %v488_v21 = vmul.f32 %v486_v19, %v479_v12 }
 0x6ad   :  { %v490_v22 = vadd.f32 %v488_v21, %v479_v12 }
 0x6af   :  { %v492_v23 = vmul.f32 0.7978846, %v490_v22  ;;  %v1699_v25 = vpop.eup %1698  ;;  %v628_v22 = vperm.slane %v1865_v6, 7 }
 0x6b0   :  { %v495_v26 = vadd.f32 1.0, %v1699_v25 }
 0x6b1   :  { %1700 = vtanh.f32 %v492_v23 }
 0x6b2   :  { %v497_v31 = vmul.f32 %v495_v26, %v481_v29 }
 0x6b7   :  { %v1701_v28 = vpop.eup %1700 }
 0x6b8   :  { %v496_v30 = vadd.f32 1.0, %v1701_v28 }
 0x6ba   :  { %v498_v32 = vmul.f32 %v496_v30, %v482_v20 }
 0x6bc   :  { %v515_v33 = vpack.c.bf16 %v498_v32, %v497_v31  ;;  %v2068_v31 = vld [vmem:[%s2259_s6 + $0x8] sm:$0xff] }
 0x6bd   :  { %v639_v6 = vperm.slane %v2068_v31, 0 }
 0x6be   :  { %573 = vmatmul.bf16.vlgmr.msrb.gmra.mxu3 %v515_v33 }
 0x741   :  { %v574_v27 = vpop.f32.mrf.mxu3 }
 0x742   :  { %v575_v24 = vadd.f32 %v574_v27, %v516_v35 }
 0x744   :  { %v579_v36 = vadd.f32 %v575_v24, %v444_v57  ;;  %v1565_v57 = vld [vmem:[%s2255_s2 + $0x18] sm:$0xff] }
 0x745   :  { %661 = vmatpush.bf16.msra.mxu0 %v1565_v57 }
 0x746   :  { %v581_v37 = vsel %vm66_vm0, %v579_v36, 0.0 }
 0x747   :  { %582 = vadd.xlane.f32.xlu2 %v581_v37 }
 0x749   :  { %v576_v39 = vpop.f32.mrf.mxu3  ;;  %662 = vmatpush.bf16.msra.mxu0 %v1564_v61 }
 0x74a   :  { %v577_v40 = vadd.f32 %v576_v39, %v516_v35 }
 0x74c   :  { %v580_v41 = vadd.f32 %v577_v40, %v445_v59 }
 0x74e   :  { %v584_v43 = vsel %vm66_vm0, %v580_v41, 0.0 }
 0x74f   :  { %585 = vadd.xlane.f32.xlu0 %v584_v43 }
 0x7ba   :  { %v583_v44 = vpop.xlane.xlu2 %582 }
 0x7bb   :  { %v587_v45 = vmul.f32 %v583_v44, %v1999_v15 }
 0x7bd   :  { %v589_v47 = vsub.f32 %v579_v36, %v587_v45 }
 0x7bf   :  { %v591_v48 = vmul.f32 %v589_v47, %v589_v47 }
 0x7c1   :  { %v593_v49 = vsel %vm66_vm0, %v591_v48, 0.0 }
 0x7c2   :  { %v586_v51 = vpop.xlane.xlu0 %585  ;;  %594 = vadd.xlane.f32.xlu1 %v593_v49 }
 0x7c3   :  { %v588_v52 = vmul.f32 %v586_v51, %v1999_v15 }
 0x7c5   :  { %v590_v53 = vsub.f32 %v580_v41, %v588_v52 }
 0x7c7   :  { %v592_v55 = vmul.f32 %v590_v53, %v590_v53 }
 0x7c9   :  { %v596_v56 = vsel %vm66_vm0, %v592_v55, 0.0 }
 0x7ca   :  { %597 = vadd.xlane.f32.xlu2 %v596_v56 }
 0x835   :  { %v595_v59 = vpop.xlane.xlu1 %594 }
 0x836   :  { %v599_v60 = vmul.f32 %v595_v59, %v1999_v15 }
 0x838   :  { %v601_v63 = vadd.f32 1e-12, %v599_v60 }
 0x83a   :  { %1702 = vrsqrt.f32 %v601_v63  ;;  %vm609_vm13 = vweird.f32 %v601_v63 }
 0x83d   :  { %v598_v0 = vpop.xlane.xlu2 %597 }
 0x83e   :  { %v600_v1 = vmul.f32 %v598_v0, %v1999_v15 }
 0x840   :  { %v1703_v4 = vpop.eup %1702  ;;  %v602_v5 = vadd.f32 1e-12, %v600_v1 }
 0x841   :  { %v604_v7 = vmul.f32 %v1703_v4, %v601_v63  ;;  %vm610_vm12 = vweird.f32 %v1703_v4 }
 0x842   :  { %1704 = vrsqrt.f32 %v602_v5  ;;  %vm611_vm14 = vmor %vm609_vm13, %vm610_vm12  ;;  %vm619_vm5 = vweird.f32 %v602_v5 }
 0x843   :  { %v605_v8 = vmul.f32 %v1703_v4, %v604_v7 }
 0x845   :  { %v606_v9 = vmul.f32 0.5, %v605_v8 }
 0x847   :  { %v607_v11 = vsub.f32 1.5, %v606_v9 }
 0x848   :  { %v1705_v10 = vpop.eup %1704 }
 0x849   :  { %v608_v13 = vmul.f32 %v1703_v4, %v607_v11  ;;  %v614_v14 = vmul.f32 %v1705_v10, %v602_v5  ;;  %vm620_vm15 = vweird.f32 %v1705_v10 }
 0x84a   :  { %vm621_vm6 = vmor %vm619_vm5, %vm620_vm15  ;;  %vm1211_vm15 = vcmask 1040384  }
 0x84b   :  { %v615_v2 = vmul.f32 %v1705_v10, %v614_v14  ;;  %v612_v16 = vsel %vm611_vm14, %v1703_v4, %v608_v13 }
 0x84c   :  { %v623_v19 = vmul.f32 %v612_v16, %v589_v47 }
 0x84d   :  { %v616_v12 = vmul.f32 0.5, %v615_v2 }
 0x84e   :  { %v626_v23 = vmul.f32 %v625_v3, %v623_v19 }
 0x84f   :  { %v617_v17 = vsub.f32 1.5, %v616_v12 }
 0x850   :  { %v2058_v28 = vadd.f32 %v628_v22, %v626_v23 }
 0x851   :  { %v618_v18 = vmul.f32 %v1705_v10, %v617_v17 }
 0x853   :  { %v622_v21 = vsel %vm621_vm6, %v1705_v10, %v618_v18 }
 0x854   :  { %v624_v25 = vmul.f32 %v622_v21, %v590_v53 }
 0x856   :  { %v627_v26 = vmul.f32 %v625_v3, %v624_v25 }
 0x858   :  { %v2060_v29 = vadd.f32 %v628_v22, %v627_v26 }
 0x85a   :  { %v638_v20 = vpack.c.bf16 %v2060_v29, %v2058_v28 }
 0x85c   :  { %1426 = vmatmul.msk.bf16.vlgmr.msra.gmra.mxu0 %vm66_vm0, %v638_v20 }
 0x8d9   :  { %v664_v30 = vpop.f32.mrf.mxu0 }
 0x8da   :  { %v665_v33 = vadd.f32 %v664_v30, %v639_v6 }
 0x8e1   :  { %v666_v32 = vpop.f32.mrf.mxu0 }
 0x8e2   :  { %v667_v35 = vadd.f32 %v666_v32, %v639_v6 }
 0x8e4   :  { %v1638_v27 = vpack.i.bf16 %v667_v35, %v665_v33  ;;  %v2074_v24 = vpack.c.bf16 %v667_v35, %v665_v33 }
 0x8e6   :  { %1639 = vrot.lane.b32.xlu2 %v1638_v27, %s1778_s0  ;;  %1634 = vrot.lane.b32.xlu1 %v1638_v27, %s1780_s24 }
 0x8e7   :  { %1629 = vrot.lane.b32.xlu0 %v1638_v27, %s1779_s23 }
 0x8ee   :  { %697 = vrot.lane.b32.xlu2 %v2074_v24, %s1781_s25 }
 0x940   :  { %v1640_v47 = vpop.permute.xlu2 %1639 }
 0x941   :  { %v1642_v48 = vunpack.i.h.bf16 %v1640_v47  ;;  %v1641_v49 = vunpack.i.l.bf16 %v1640_v47 }
 0x943   :  { %v2084_v51 = vpack.c.bf16 %v1642_v48, %v1641_v49 }
 0x948   :  { %v698_v52 = vpop.permute.xlu2 %697 }
 0x949   :  { %v718_v63 = vsel %vm120_vm1, %v698_v52, 0 }
 0x958   :  { %v1635_v36 = vpop.permute.xlu1 %1634 }
 0x959   :  { %v1637_v37 = vunpack.i.h.bf16 %v1635_v36  ;;  %v1636_v39 = vunpack.i.l.bf16 %v1635_v36  ;;  %v1630_v40 = vpop.permute.xlu0 %1629 }
 0x95a   :  { %v1632_v41 = vunpack.i.h.bf16 %v1630_v40  ;;  %v1631_v43 = vunpack.i.l.bf16 %v1630_v40 }
 0x95b   :  { %v2078_v44 = vpack.c.bf16 %v1637_v37, %v1636_v39 }
 0x95c   :  { %v692_v45 = vpack.c.bf16 %v1632_v41, %v1631_v43 }
 0x95d   :  { %701 = vrot.lane.b32.xlu1 %v2078_v44, %s1781_s25 }
 0x95e   :  { %703 = vrot.lane.b32.xlu0 %v692_v45, %s1781_s25  ;;  %856 = vrot.lane.b32.xlu2 %v692_v45, %s1782_s26 }
 0x966   :  { %699 = vrot.lane.b32.xlu0 %v2084_v51, %s1781_s25 }
 0x9b8   :  { %v857_v53 = vpop.permute.xlu2 %856 }
 0x9b9   :  { %878 = vmatpush.bf16.msra.mxu3 %v857_v53 }
 0x9cf   :  { %v702_v57 = vpop.permute.xlu1 %701 }
 0x9d0   :  { %v704_v55 = vpop.permute.xlu0 %703  ;;  %v724_v59 = vsel %vm120_vm1, %v702_v57, 0 }
 0x9d1   :  { %v727_v56 = vsel %vm120_vm1, %v704_v55, 0 }
 0x9d2   :  { %733 = vmatpush.bf16.xpose.msrb.mxu0 %v727_v56 }
 0x9d8   :  { %v700_v60 = vpop.permute.xlu0 %699 }
 0x9d9   :  { %v721_v61 = vsel %vm120_vm1, %v700_v60, 0 }
 0x9da   :  { %734 = vmatpush.bf16.xpose.msrb.mxu0 %v724_v59 }
 0x9e2   :  { %735 = vmatpush.bf16.xpose.msrb.mxu0 %v721_v61 }
 0x9ea   :  { %736 = vmatpush.bf16.xpose.msrb.mxu0 %v718_v63 }
 0x9f1   :  { %1427 = vmatmul.msk.bf16.vlgmr.msrb.gmra.mxu0 %vm120_vm1, %v2074_v24 }
 0xa01   :  { %1428 = vmatmul.msk.bf16.gmra.mxu0 %vm120_vm1, %v2084_v51 }
 0xa11   :  { %1429 = vmatmul.msk.bf16.gmra.mxu0 %vm120_vm1, %v2078_v44 }
 0xa21   :  { %1430 = vmatmul.msk.bf16.gmra.mxu0 %vm120_vm1, %v692_v45 }
 0xa6e   :  { %v738_v0 = vpop.f32.mrf.mxu0 }
 0xa6f   :  { %v739_v1 = vadd.f32 %v738_v0, %v1899_v34 }
 0xa71   :  { %v758_v4 = vsel %vm174_vm2, %v739_v1, -inf }
 0xa72   :  { %759 = vmax.xlane.f32.xlu1 %v758_v4 }
 0xa76   :  { %v740_v5 = vpop.f32.mrf.mxu0 }
 0xa77   :  { %v741_v7 = vadd.f32 %v740_v5, %v1906_v38 }
 0xa79   :  { %v761_v8 = vsel %vm174_vm2, %v741_v7, -inf }
 0xa7a   :  { %762 = vmax.xlane.f32.xlu0 %v761_v8 }
 0xa7e   :  { %v743_v9 = vpop.f32.mrf.mxu0 }
 0xa7f   :  { %v744_v11 = vadd.f32 %v743_v9, %v1913_v42 }
 0xa81   :  { %v764_v10 = vsel %vm174_vm2, %v744_v11, -inf }
 0xa82   :  { %765 = vmax.xlane.f32.xlu2 %v764_v10 }
 0xa86   :  { %v745_v13 = vpop.f32.mrf.mxu0 }
 0xa87   :  { %v746_v14 = vadd.f32 %v745_v13, %v1920_v46 }
 0xa89   :  { %v767_v34 = vsel %vm174_vm2, %v746_v14, -inf }
 0xa8a   :  { %768 = vmax.xlane.f32.xlu1 %v767_v34 }
 0xa8e   :  { %v748_v2 = vpop.f32.mrf.mxu0 }
 0xa8f   :  { %v749_v16 = vadd.f32 %v748_v2, %v1927_v50 }
 0xa91   :  { %v770_v38 = vsel %vm174_vm2, %v749_v16, -inf }
 0xa92   :  { %771 = vmax.xlane.f32.xlu0 %v770_v38 }
 0xa96   :  { %v750_v12 = vpop.f32.mrf.mxu0 }
 0xa97   :  { %v751_v17 = vadd.f32 %v750_v12, %v1934_v54 }
 0xa99   :  { %v773_v42 = vsel %vm174_vm2, %v751_v17, -inf }
 0xa9a   :  { %774 = vmax.xlane.f32.xlu2 %v773_v42 }
 0xa9e   :  { %v753_v3 = vpop.f32.mrf.mxu0 }
 0xa9f   :  { %v754_v19 = vadd.f32 %v753_v3, %v1941_v58 }
 0xaa1   :  { %v776_v46 = vsel %vm174_vm2, %v754_v19, -inf }
 0xaa2   :  { %777 = vmax.xlane.f32.xlu1 %v776_v46 }
 0xaa6   :  { %v755_v18 = vpop.f32.mrf.mxu0 }
 0xaa7   :  { %v756_v21 = vadd.f32 %v755_v18, %v1948_v62 }
 0xaa9   :  { %v779_v50 = vsel %vm174_vm2, %v756_v21, -inf }
 0xaaa   :  { %780 = vmax.xlane.f32.xlu0 %v779_v50 }
 0xab2   :  { %850 = vrot.lane.b32.xlu2 %v2074_v24, %s1782_s26 }
 0xae5   :  { %v760_v22 = vpop.xlane.xlu1 %759 }
 0xae6   :  { %v782_v54 = vsub.f32 %v739_v1, %v760_v22 }
 0xae8   :  { %v790_v23 = vmul.f32 1.442695, %v782_v54 }
 0xaea   :  { %1706 = vpow2.f32 %v790_v23 }
 0xaed   :  { %v763_v25 = vpop.xlane.xlu0 %762 }
 0xaee   :  { %v783_v26 = vsub.f32 %v741_v7, %v763_v25 }
 0xaf0   :  { %v2117_v20 = vpop.eup %1706  ;;  %v792_v58 = vmul.f32 1.442695, %v783_v26 }
 0xaf1   :  { %v806_v30 = vsel %vm174_vm2, %v2117_v20, 0.0 }
 0xaf2   :  { %1708 = vpow2.f32 %v792_v58  ;;  %807 = vadd.xlane.f32.xlu1 %v806_v30 }
 0xaf5   :  { %v766_v62 = vpop.xlane.xlu2 %765 }
 0xaf6   :  { %v784_v6 = vsub.f32 %v744_v11, %v766_v62 }
 0xaf8   :  { %v1709_v32 = vpop.eup %1708  ;;  %v794_v33 = vmul.f32 1.442695, %v784_v6 }
 0xaf9   :  { %v809_v35 = vsel %vm174_vm2, %v1709_v32, 0.0 }
 0xafa   :  { %1710 = vpow2.f32 %v794_v33  ;;  %810 = vadd.xlane.f32.xlu0 %v809_v35 }
 0xafd   :  { %v769_v49 = vpop.xlane.xlu1 %768 }
 0xafe   :  { %v785_v52 = vsub.f32 %v746_v14, %v769_v49 }
 0xb00   :  { %v1711_v27 = vpop.eup %1710  ;;  %v796_v56 = vmul.f32 1.442695, %v785_v52 }
 0xb01   :  { %v812_v24 = vsel %vm174_vm2, %v1711_v27, 0.0 }
 0xb02   :  { %813 = vadd.xlane.f32.xlu2 %v812_v24 }
 0xb05   :  { %v772_v40 = vpop.xlane.xlu0 %771 }
 0xb0b   :  { %854 = vrot.lane.b32.xlu1 %v2078_v44, %s1782_s26  ;;  %v786_v44 = vsub.f32 %v749_v16, %v772_v40 }
 0xb0d   :  { %v775_v36 = vpop.xlane.xlu2 %774  ;;  %v798_v53 = vmul.f32 1.442695, %v786_v44 }
 0xb0e   :  { %v787_v37 = vsub.f32 %v751_v17, %v775_v36  ;;  %852 = vrot.lane.b32.xlu0 %v2084_v51, %s1782_s26 }
 0xb10   :  { %v800_v39 = vmul.f32 1.442695, %v787_v37  ;;  %v1567_v37 = vld [vmem:[%s2256_s3 + $0x18] sm:$0xff] }
 0xb11   :  { %961 = vmatpush.bf16.msrb.mxu2 %v1567_v37 }
 0xb12   :  { %1712 = vpow2.f32 %v800_v39  ;;  %v1566_v39 = vld [vmem:[%s2256_s3 + $0x10] sm:$0xff] }
 0xb15   :  { %v778_v57 = vpop.xlane.xlu1 %777  ;;  %v851_v34 = vpop.permute.xlu2 %850  ;;  %962 = vmatpush.bf16.msrb.mxu2 %v1566_v39 }
 0xb16   :  { %v788_v59 = vsub.f32 %v754_v19, %v778_v57 }
 0xb18   :  { %v2127_v41 = vpop.eup %1712  ;;  %v802_v61 = vmul.f32 1.442695, %v788_v59 }
 0xb19   :  { %v821_v43 = vsel %vm174_vm2, %v2127_v41, 0.0 }
 0xb1a   :  { %822 = vadd.xlane.f32.xlu2 %v821_v43 }
 0xb1d   :  { %v781_v45 = vpop.xlane.xlu0 %780 }
 0xb1e   :  { %v789_v47 = vsub.f32 %v756_v21, %v781_v45 }
 0xb20   :  { %v804_v48 = vmul.f32 1.442695, %v789_v47 }
 0xb22   :  { %1714 = vpow2.f32 %v804_v48 }
 0xb23   :  { %1716 = vpow2.f32 %v798_v53 }
 0xb24   :  { %1718 = vpow2.f32 %v796_v56 }
 0xb25   :  { %1720 = vpow2.f32 %v802_v61 }
 0xb28   :  { %v1715_v55 = vpop.eup %1714 }
 0xb29   :  { %v827_v51 = vsel %vm174_vm2, %v1715_v55, 0.0  ;;  %v1717_v60 = vpop.eup %1716 }
 0xb2a   :  { %828 = vadd.xlane.f32.xlu2 %v827_v51  ;;  %v1719_v63 = vpop.eup %1718  ;;  %v818_v0 = vsel %vm174_vm2, %v1717_v60, 0.0 }
 0xb2b   :  { %v815_v1 = vsel %vm174_vm2, %v1719_v63, 0.0  ;;  %v1721_v4 = vpop.eup %1720 }
 0xb2c   :  { %v824_v5 = vsel %vm174_vm2, %v1721_v4, 0.0 }
 0xb35   :  { %819 = vadd.xlane.f32.xlu1 %v818_v0 }
 0xb38   :  { %816 = vadd.xlane.f32.xlu0 %v815_v1 }
 0xb40   :  { %825 = vadd.xlane.f32.xlu0 %v824_v5 }
 0xb65   :  { %v808_v7 = vpop.xlane.xlu1 %807 }
 0xb6d   :  { %v811_v8 = vpop.xlane.xlu0 %810 }
 0xb6e   :  { %1722 = vrcp.f32 %v811_v8 }
 0xb6f   :  { %1724 = vrcp.f32 %v808_v7  ;;  %v939_v7 = vperm.slane %v2068_v31, 1 }
 0xb74   :  { %v1723_v11 = vpop.eup %1722 }
 0xb75   :  { %v1725_v13 = vpop.eup %1724  ;;  %v839_v14 = vmul.f32 %v1723_v11, %v1709_v32  ;;  %v814_v38 = vpop.xlane.xlu2 %813 }
 0xb76   :  { %v838_v2 = vmul.f32 %v1725_v13, %v2117_v20  ;;  %1726 = vrcp.f32 %v814_v38 }
 0xb78   :  { %v846_v16 = vpack.c.bf16 %v839_v14, %v838_v2 }
 0xb7c   :  { %v1727_v17 = vpop.eup %1726 }
 0xb7d   :  { %v855_v9 = vpop.permute.xlu1 %854  ;;  %v840_v3 = vmul.f32 %v1727_v17, %v1711_v27 }
 0xb7e   :  { %879 = vmatpush.bf16.msra.mxu3 %v855_v9 }
 0xb80   :  { %v853_v10 = vpop.permute.xlu0 %852 }
 0xb82   :  { %880 = vmatpush.bf16.msra.mxu3 %v853_v10 }
 0xb86   :  { %881 = vmatpush.bf16.msra.mxu3 %v851_v34 }
 0xb89   :  { %1431 = vmatmul.msk.bf16.vlgmr.msra.gmra.mxu3 %vm174_vm2, %v846_v16  ;;  %v1569_v16 = vld [vmem:[%s2257_s4 + $0x18] sm:$0xff] }
 0xb8a   :  { %1049 = vmatpush.bf16.msrb.mxu1 %v1569_v16 }
 0xb8d   :  { %v823_v21 = vpop.xlane.xlu2 %822 }
 0xb9d   :  { %v829_v20 = vpop.xlane.xlu2 %828 }
 0xba8   :  { %v820_v46 = vpop.xlane.xlu1 %819 }
 0xbab   :  { %v817_v12 = vpop.xlane.xlu0 %816 }
 0xbac   :  { %1728 = vrcp.f32 %v817_v12 }
 0xbad   :  { %1730 = vrcp.f32 %v820_v46 }
 0xbae   :  { %1732 = vrcp.f32 %v823_v21  ;;  %v1568_v21 = vld [vmem:[%s2257_s4 + $0x10] sm:$0xff] }
 0xbaf   :  { %1050 = vmatpush.bf16.msrb.mxu1 %v1568_v21  ;;  %v1093_v21 = vperm.slane %v2068_v31, 5 }
 0xbb2   :  { %v1729_v42 = vpop.eup %1728 }
 0xbb3   :  { %v841_v19 = vmul.f32 %v1729_v42, %v1719_v63  ;;  %v1731_v50 = vpop.eup %1730  ;;  %v826_v25 = vpop.xlane.xlu0 %825 }
 0xbb4   :  { %v1733_v22 = vpop.eup %1732  ;;  %v842_v54 = vmul.f32 %v1731_v50, %v1717_v60  ;;  %1734 = vrcp.f32 %v826_v25 }
 0xbb5   :  { %v847_v18 = vpack.c.bf16 %v841_v19, %v840_v3  ;;  %v843_v23 = vmul.f32 %v1733_v22, %v2127_v41  ;;  %1736 = vrcp.f32 %v829_v20 }
 0xbb7   :  { %1432 = vmatmul.msk.bf16.gmra.mxu3 %vm174_vm2, %v847_v18  ;;  %v848_v26 = vpack.c.bf16 %v843_v23, %v842_v54 }
 0xbba   :  { %v1735_v58 = vpop.eup %1734 }
 0xbbb   :  { %v1737_v30 = vpop.eup %1736  ;;  %v844_v62 = vmul.f32 %v1735_v58, %v1721_v4 }
 0xbbc   :  { %v845_v6 = vmul.f32 %v1737_v30, %v1715_v55 }
 0xbbe   :  { %v849_v32 = vpack.c.bf16 %v845_v6, %v844_v62 }
 0xbc7   :  { %1433 = vmatmul.msk.bf16.gmra.mxu3 %vm174_vm2, %v848_v26 }
 0xbd7   :  { %1434 = vmatmul.msk.bf16.gmra.mxu3 %vm174_vm2, %v849_v32 }
 0xc0c   :  { %v883_v33 = vpop.f32.mrf.mxu3 }
 0xc14   :  { %v885_v35 = vpop.f32.mrf.mxu3 }
 0xc3a   :  { %v888_v27 = vpop.f32.mrf.mxu3 }
 0xc42   :  { %v890_v24 = vpop.f32.mrf.mxu3 }
 0xc43   :  { %v1643_v36 = vpack.i.bf16 %v890_v24, %v888_v27 }
 0xc45   :  { %1644 = vrot.lane.b32.xlu1 %v1643_v36, %s1783_s1 }
 0xc4a   :  { %v893_v40 = vpop.f32.mrf.mxu3 }
 0xc52   :  { %v895_v41 = vpop.f32.mrf.mxu3 }
 0xc53   :  { %v1648_v43 = vpack.i.bf16 %v895_v41, %v893_v40  ;;  %v1015_v40 = vperm.slane %v2068_v31, 2 }
 0xc55   :  { %1649 = vrot.lane.b32.xlu0 %v1648_v43, %s1784_s27 }
 0xc5a   :  { %v898_v45 = vpop.f32.mrf.mxu3 }
 0xc62   :  { %v900_v47 = vpop.f32.mrf.mxu3 }
 0xc63   :  { %v1653_v48 = vpack.i.bf16 %v900_v47, %v898_v45 }
 0xc65   :  { %1654 = vrot.lane.b32.xlu2 %v1653_v48, %s1785_s28  ;;  %v1018_v48 = vperm.slane %v2068_v31, 3 }
 0xcb7   :  { %v1645_v49 = vpop.permute.xlu1 %1644 }
 0xcb8   :  { %v1647_v44 = vunpack.i.h.bf16 %v1645_v49  ;;  %v1646_v52 = vunpack.i.l.bf16 %v1645_v49 }
 0xcba   :  { %v928_v57 = vsel %vm120_vm1, %v885_v35, %v1647_v44  ;;  %v927_v59 = vsel %vm120_vm1, %v883_v33, %v1646_v52 }
 0xcbf   :  { %v1655_v53 = vpop.permute.xlu2 %1654 }
 0xcc0   :  { %v1657_v60 = vunpack.i.h.bf16 %v1655_v53  ;;  %v1656_v61 = vunpack.i.l.bf16 %v1655_v53 }
 0xcc7   :  { %v1650_v55 = vpop.permute.xlu0 %1649 }
 0xcc8   :  { %v1652_v51 = vunpack.i.h.bf16 %v1650_v55  ;;  %v1651_v56 = vunpack.i.l.bf16 %v1650_v55  ;;  %v1577_v55 = vld [vmem:[%s2258_s5 + $0x78] sm:$0xff] }
 0xcc9   :  { %1142 = vmatpush.bf16.msra.mxu2 %v1577_v55  ;;  %v1586_v55 = vld [vmem:[%s2261_s8 + $0x30] sm:$0xff] }
 0xcca   :  { %v930_v63 = vsel %vm346_vm3, %v928_v57, %v1652_v51  ;;  %v929_v0 = vsel %vm346_vm3, %v927_v59, %v1651_v56  ;;  %v1576_v51 = vld [vmem:[%s2258_s5 + $0x70] sm:$0xff]  ;;  %v1575_v56 = vld [vmem:[%s2258_s5 + $0x68] sm:$0xff]  ;;  %v1574_v57 = vld [vmem:[%s2258_s5 + $0x60] sm:$0xff] }
 0xccb   :  { %v931_v1 = vsel %vm349_vm4, %v929_v0, %v1656_v61  ;;  %v932_v4 = vsel %vm349_vm4, %v930_v63, %v1657_v60  ;;  %v1573_v59 = vld [vmem:[%s2258_s5 + $0x58] sm:$0xff]  ;;  %v1572_v60 = vld [vmem:[%s2258_s5 + $0x50] sm:$0xff]  ;;  %v1571_v61 = vld [vmem:[%s2258_s5 + $0x48] sm:$0xff]  ;;  %v1027_v0 = vperm.slane %v2068_v31, 4 }
 0xccc   :  { %v938_v5 = vpack.c.bf16 %v932_v4, %v931_v1  ;;  %v1570_v63 = vld [vmem:[%s2258_s5 + $0x40] sm:$0xff] }
 0xccd   :  { %1143 = vmatpush.bf16.msra.mxu2 %v1576_v51 }
 0xcce   :  { %1447 = vmatmul.msk.bf16.vlgmr.msrb.gmra.mxu2 %vm66_vm0, %v938_v5 }
 0xcd1   :  { %1144 = vmatpush.bf16.msra.mxu2 %v1575_v56 }
 0xcd5   :  { %1145 = vmatpush.bf16.msra.mxu2 %v1574_v57 }
 0xcd9   :  { %1146 = vmatpush.bf16.msra.mxu2 %v1573_v59 }
 0xcdd   :  { %1147 = vmatpush.bf16.msra.mxu2 %v1572_v60 }
 0xce1   :  { %1148 = vmatpush.bf16.msra.mxu2 %v1571_v61  ;;  %v1584_v61 = vld [vmem:[%s2261_s8 + $0x20] sm:$0xff] }
 0xce5   :  { %1149 = vmatpush.bf16.msra.mxu2 %v1570_v63 }
 0xd51   :  { %v964_v8 = vpop.f32.mrf.mxu2 }
 0xd52   :  { %v965_v9 = vadd.f32 %v964_v8, %v939_v7 }
 0xd54   :  { %v969_v11 = vadd.f32 %v965_v9, %v2058_v28 }
 0xd56   :  { %v971_v10 = vsel %vm66_vm0, %v969_v11, 0.0 }
 0xd57   :  { %972 = vadd.xlane.f32.xlu0 %v971_v10 }
 0xd59   :  { %v966_v13 = vpop.f32.mrf.mxu2 }
 0xd5a   :  { %v967_v14 = vadd.f32 %v966_v13, %v939_v7 }
 0xd5c   :  { %v970_v34 = vadd.f32 %v967_v14, %v2060_v29 }
 0xd5e   :  { %v974_v2 = vsel %vm66_vm0, %v970_v34, 0.0 }
 0xd5f   :  { %975 = vadd.xlane.f32.xlu1 %v974_v2 }
 0xdca   :  { %v973_v38 = vpop.xlane.xlu0 %972 }
 0xdcb   :  { %v977_v12 = vmul.f32 %v973_v38, %v1999_v15 }
 0xdcd   :  { %v979_v17 = vsub.f32 %v969_v11, %v977_v12 }
 0xdcf   :  { %v981_v28 = vmul.f32 %v979_v17, %v979_v17 }
 0xdd1   :  { %v983_v42 = vsel %vm66_vm0, %v981_v28, 0.0 }
 0xdd2   :  { %v976_v3 = vpop.xlane.xlu1 %975  ;;  %984 = vadd.xlane.f32.xlu2 %v983_v42 }
 0xdd3   :  { %v978_v19 = vmul.f32 %v976_v3, %v1999_v15 }
 0xdd5   :  { %v980_v29 = vsub.f32 %v970_v34, %v978_v19 }
 0xdd7   :  { %v982_v46 = vmul.f32 %v980_v29, %v980_v29 }
 0xdd9   :  { %v986_v18 = vsel %vm66_vm0, %v982_v46, 0.0 }
 0xdda   :  { %987 = vadd.xlane.f32.xlu0 %v986_v18 }
 0xe45   :  { %v985_v50 = vpop.xlane.xlu2 %984 }
 0xe46   :  { %v989_v22 = vmul.f32 %v985_v50, %v1999_v15 }
 0xe48   :  { %v991_v54 = vadd.f32 1e-12, %v989_v22 }
 0xe4a   :  { %1738 = vrsqrt.f32 %v991_v54  ;;  %vm999_vm2 = vweird.f32 %v991_v54 }
 0xe4d   :  { %v988_v23 = vpop.xlane.xlu0 %987 }
 0xe4e   :  { %v990_v25 = vmul.f32 %v988_v23, %v1999_v15 }
 0xe50   :  { %v1739_v26 = vpop.eup %1738  ;;  %v992_v20 = vadd.f32 1e-12, %v990_v25 }
 0xe51   :  { %v994_v58 = vmul.f32 %v1739_v26, %v991_v54  ;;  %vm1000_vm1 = vweird.f32 %v1739_v26 }
 0xe52   :  { %1740 = vrsqrt.f32 %v992_v20  ;;  %vm1001_vm3 = vmor %vm999_vm2, %vm1000_vm1  ;;  %vm1009_vm7 = vweird.f32 %v992_v20 }
 0xe53   :  { %v995_v30 = vmul.f32 %v1739_v26, %v994_v58 }
 0xe55   :  { %v996_v62 = vmul.f32 0.5, %v995_v30 }
 0xe57   :  { %v997_v6 = vsub.f32 1.5, %v996_v62 }
 0xe58   :  { %v1741_v32 = vpop.eup %1740 }
 0xe59   :  { %v998_v33 = vmul.f32 %v1739_v26, %v997_v6  ;;  %v1004_v35 = vmul.f32 %v1741_v32, %v992_v20  ;;  %vm1010_vm4 = vweird.f32 %v1741_v32 }
 0xe5a   :  { %vm1011_vm8 = vmor %vm1009_vm7, %vm1010_vm4 }
 0xe5b   :  { %v1005_v27 = vmul.f32 %v1741_v32, %v1004_v35  ;;  %v1002_v24 = vsel %vm1001_vm3, %v1739_v26, %v998_v33 }
 0xe5c   :  { %v1013_v39 = vmul.f32 %v1002_v24, %v979_v17 }
 0xe5d   :  { %v1006_v36 = vmul.f32 0.5, %v1005_v27 }
 0xe5e   :  { %v1016_v47 = vmul.f32 %v1015_v40, %v1013_v39 }
 0xe5f   :  { %v1007_v37 = vsub.f32 1.5, %v1006_v36 }
 0xe60   :  { %v1019_v44 = vadd.f32 %v1018_v48, %v1016_v47 }
 0xe61   :  { %v1008_v41 = vmul.f32 %v1741_v32, %v1007_v37 }
 0xe63   :  { %v1012_v43 = vsel %vm1011_vm8, %v1741_v32, %v1008_v41  ;;  %v1579_v41 = vld [vmem:[%s2260_s7 + $0x8] sm:$0xff] }
 0xe64   :  { %v1014_v45 = vmul.f32 %v1012_v43, %v980_v29  ;;  %1241 = vmatpush.bf16.msra.mxu1 %v1579_v41 }
 0xe66   :  { %v1017_v49 = vmul.f32 %v1015_v40, %v1014_v45  ;;  %v1578_v45 = vld [vmem:[%s2260_s7] sm:$0xff] }
 0xe68   :  { %v1020_v52 = vadd.f32 %v1018_v48, %v1017_v49  ;;  %1242 = vmatpush.bf16.msra.mxu1 %v1578_v45  ;;  %v1587_v49 = vld [vmem:[%s2261_s8 + $0x38] sm:$0xff] }
 0xe69   :  { %1316 = vmatpush.bf16.msrb.mxu3 %v1587_v49 }
 0xe6a   :  { %v1026_v53 = vpack.c.bf16 %v1020_v52, %v1019_v44 }
 0xe6c   :  { %1460 = vmatmul.msk.bf16.vlgmr.msrb.gmra.mxu1 %vm66_vm0, %v1026_v53 }
 0xe6d   :  { %1317 = vmatpush.bf16.msrb.mxu3 %v1586_v55 }
 0xee9   :  { %v1052_v1 = vpop.f32.mrf.mxu1 }
 0xeea   :  { %v1053_v4 = vadd.f32 %v1052_v1, %v1027_v0 }
 0xeec   :  { %v1059_v5 = vmul.f32 0.044715, %v1053_v4  ;;  %v1057_v42 = vmul.f32 0.5, %v1053_v4 }
 0xeee   :  { %v1061_v7 = vmul.f32 %v1059_v5, %v1053_v4 }
 0xef0   :  { %v1063_v8 = vmul.f32 %v1061_v7, %v1053_v4 }
 0xef1   :  { %v1054_v9 = vpop.f32.mrf.mxu1 }
 0xef2   :  { %v1065_v11 = vadd.f32 %v1063_v8, %v1053_v4  ;;  %v1055_v10 = vadd.f32 %v1054_v9, %v1027_v0  ;;  %v1583_v4 = vld [vmem:[%s2261_s8 + $0x18] sm:$0xff]  ;;  %v1582_v9 = vld [vmem:[%s2261_s8 + $0x10] sm:$0xff] }
 0xef4   :  { %v1060_v13 = vmul.f32 0.044715, %v1055_v10  ;;  %v1067_v14 = vmul.f32 0.7978846, %v1065_v11  ;;  %v1058_v3 = vmul.f32 0.5, %v1055_v10  ;;  %v1202_v11 = vperm.slane %v2068_v31, 6 }
 0xef6   :  { %v1062_v34 = vmul.f32 %v1060_v13, %v1055_v10  ;;  %1742 = vtanh.f32 %v1067_v14 }
 0xef8   :  { %v1064_v2 = vmul.f32 %v1062_v34, %v1055_v10  ;;  %v1581_v34 = vld [vmem:[%s2261_s8 + $0x8] sm:$0xff] }
 0xefa   :  { %v1066_v16 = vadd.f32 %v1064_v2, %v1055_v10  ;;  %v1205_v2 = vperm.slane %v2068_v31, 7  ;;  %v1658_v31 = vld [vmem:[%s2262_s9] ss:$0 sm:$0xff] }
 0xefc   :  { %v1068_v38 = vmul.f32 0.7978846, %v1066_v16  ;;  %v1743_v12 = vpop.eup %1742 }
 0xefd   :  { %v1071_v17 = vadd.f32 1.0, %v1743_v12 }
 0xefe   :  { %1744 = vtanh.f32 %v1068_v38 }
 0xeff   :  { %v1073_v29 = vmul.f32 %v1071_v17, %v1057_v42 }
 0xf04   :  { %v1745_v28 = vpop.eup %1744 }
 0xf05   :  { %v1072_v19 = vadd.f32 1.0, %v1745_v28 }
 0xf07   :  { %v1074_v46 = vmul.f32 %v1072_v19, %v1058_v3  ;;  %v1580_v19 = vld [vmem:[%s2261_s8] sm:$0xff] }
 0xf09   :  { %v1092_v18 = vpack.c.bf16 %v1074_v46, %v1073_v29 }
 0xf0b   :  { %1150 = vmatmul.bf16.vlgmr.msra.gmra.mxu2 %v1092_v18 }
 0xf8e   :  { %v1151_v50 = vpop.f32.mrf.mxu2 }
 0xf8f   :  { %v1152_v22 = vadd.f32 %v1151_v50, %v1093_v21 }
 0xf91   :  { %v1156_v54 = vadd.f32 %v1152_v22, %v1019_v44  ;;  %v1659_v22 = vld [vmem:[%s2262_s9 + $0x1] ss:$0 sm:$0xff] }
 0xf93   :  { %v1158_v23 = vsel %vm66_vm0, %v1156_v54, 0.0 }
 0xf94   :  { %1159 = vadd.xlane.f32.xlu2 %v1158_v23 }
 0xf96   :  { %v1153_v25 = vpop.f32.mrf.mxu2 }
 0xf97   :  { %v1154_v26 = vadd.f32 %v1153_v25, %v1093_v21 }
 0xf99   :  { %v1157_v20 = vadd.f32 %v1154_v26, %v1020_v52 }
 0xf9b   :  { %v1161_v58 = vsel %vm66_vm0, %v1157_v20, 0.0 }
 0xf9c   :  { %1162 = vadd.xlane.f32.xlu1 %v1161_v58 }
0x1007   :  { %v1160_v30 = vpop.xlane.xlu2 %1159 }
0x1008   :  { %v1164_v62 = vmul.f32 %v1160_v30, %v1999_v15 }
0x100a   :  { %v1166_v6 = vsub.f32 %v1156_v54, %v1164_v62 }
0x100c   :  { %v1168_v32 = vmul.f32 %v1166_v6, %v1166_v6 }
0x100e   :  { %v1170_v33 = vsel %vm66_vm0, %v1168_v32, 0.0 }
0x100f   :  { %v1163_v35 = vpop.xlane.xlu1 %1162  ;;  %1171 = vadd.xlane.f32.xlu1 %v1170_v33 }
0x1010   :  { %v1165_v27 = vmul.f32 %v1163_v35, %v1999_v15 }
0x1012   :  { %v1167_v24 = vsub.f32 %v1157_v20, %v1165_v27 }
0x1014   :  { %v1169_v36 = vmul.f32 %v1167_v24, %v1167_v24 }
0x1016   :  { %v1173_v37 = vsel %vm66_vm0, %v1169_v36, 0.0 }
0x1017   :  { %1174 = vadd.xlane.f32.xlu0 %v1173_v37 }
0x1082   :  { %v1172_v39 = vpop.xlane.xlu1 %1171 }
0x1083   :  { %v1176_v40 = vmul.f32 %v1172_v39, %v1999_v15 }
0x1085   :  { %v1178_v43 = vadd.f32 1e-12, %v1176_v40 }
0x1087   :  { %1746 = vrsqrt.f32 %v1178_v43  ;;  %vm1186_vm10 = vweird.f32 %v1178_v43 }
0x108a   :  { %v1175_v47 = vpop.xlane.xlu0 %1174 }
0x108b   :  { %v1177_v48 = vmul.f32 %v1175_v47, %v1999_v15  ;;  %v1585_v15 = vld [vmem:[%s2261_s8 + $0x28] sm:$0xff] }
0x108c   :  { %1318 = vmatpush.bf16.msrb.mxu3 %v1585_v15 }
0x108d   :  { %v1747_v44 = vpop.eup %1746  ;;  %v1179_v52 = vadd.f32 1e-12, %v1177_v48 }
0x108e   :  { %v1181_v53 = vmul.f32 %v1747_v44, %v1178_v43  ;;  %vm1187_vm9 = vweird.f32 %v1747_v44 }
0x108f   :  { %1748 = vrsqrt.f32 %v1179_v52  ;;  %vm1188_vm11 = vmor %vm1186_vm10, %vm1187_vm9  ;;  %vm1196_vm13 = vweird.f32 %v1179_v52 }
0x1090   :  { %v1182_v51 = vmul.f32 %v1747_v44, %v1181_v53  ;;  %1319 = vmatpush.bf16.msrb.mxu3 %v1584_v61 }
0x1092   :  { %v1183_v56 = vmul.f32 0.5, %v1182_v51 }
0x1094   :  { %v1184_v57 = vsub.f32 1.5, %v1183_v56  ;;  %1320 = vmatpush.bf16.msrb.mxu3 %v1583_v4 }
0x1095   :  { %v1749_v59 = vpop.eup %1748 }
0x1096   :  { %v1191_v60 = vmul.f32 %v1749_v59, %v1179_v52  ;;  %v1185_v63 = vmul.f32 %v1747_v44, %v1184_v57  ;;  %vm1197_vm12 = vweird.f32 %v1749_v59 }
0x1097   :  { %vm1198_vm14 = vmor %vm1196_vm13, %vm1197_vm12 }
0x1098   :  { %v1192_v0 = vmul.f32 %v1749_v59, %v1191_v60  ;;  %v1189_v5 = vsel %vm1188_vm11, %v1747_v44, %v1185_v63  ;;  %1321 = vmatpush.bf16.msrb.mxu3 %v1582_v9 }
0x1099   :  { %v1200_v10 = vmul.f32 %v1189_v5, %v1166_v6 }
0x109a   :  { %v1193_v1 = vmul.f32 0.5, %v1192_v0 }
0x109b   :  { %v1203_v16 = vmul.f32 %v1202_v11, %v1200_v10 }
0x109c   :  { %v1194_v7 = vsub.f32 1.5, %v1193_v1  ;;  %1322 = vmatpush.bf16.msrb.mxu3 %v1581_v34 }
0x109d   :  { %v1206_v17 = vadd.f32 %v1205_v2, %v1203_v16 }
0x109e   :  { %v1195_v8 = vmul.f32 %v1749_v59, %v1194_v7 }
0x10a0   :  { %v1199_v13 = vsel %vm1198_vm14, %v1749_v59, %v1195_v8  ;;  %1323 = vmatpush.bf16.msrb.mxu3 %v1580_v19 }
0x10a1   :  { %v1201_v14 = vmul.f32 %v1199_v13, %v1167_v24 }
0x10a3   :  { %v1204_v38 = vmul.f32 %v1202_v11, %v1201_v14 }
0x10a5   :  { %v1207_v12 = vadd.f32 %v1205_v2, %v1204_v38 }
0x10a7   :  { %v1209_v28 = vrot.slane %v1207_v12, 7 }
0x10a9   :  { %v1212_v42 = vsel %vm1211_vm15, %v1206_v17, %v1209_v28 }
0x10aa   :  { %v1217_v3 = vpack.c.bf16 %v1212_v42, %v1212_v42 }
0x10ac   :  { %1517 = vmatmul.msk.bf16.vlgmr.msra.gmra.mxu1 %vm66_vm0, %v1217_v3 }
0x1129   :  { %v1244_v29 = vpop.f32.mrf.mxu1 }
0x112a   :  { %v1245_v46 = vadd.f32 %v1658_v31, %v1244_v29 }
0x112c   :  { %1750 = vtanh.f32 %v1245_v46 }
0x1131   :  { %v1246_v18 = vpop.f32.mrf.mxu1 }
0x1132   :  { %v1751_v21 = vpop.eup %1750 }
0x1133   :  { %v1265_v50 = vpack.c.bf16 %v1751_v21, %v1751_v21 }
0x1135   :  { %1324 = vmatmul.bf16.vlgmr.msrb.gmra.mxu3 %v1265_v50 }
0x11b8   :  { %v1325_v54 = vpop.f32.mrf.mxu3 }
0x11b9   :  { %v1326_v23 = vadd.f32 %v1659_v22, %v1325_v54 }
0x11bb   :  { %1329 = vst [vmem:[#allocation2] sm:$0x3] %v1326_v23 }
0x11bc   :  { %1340 = dma.vmem_to_hbm [thread:$0]  %s1336_s20, 32, %s1338_s22, [#allocation3]  }
0x11c0   :  { %v1327_v25 = vpop.f32.mrf.mxu3 }
0x11c1   :  { %1776 = dma.done.wait [#allocation3], 32  }
0x11c2   :  { %1777 = vsyncadd [#allocation3], 4294967264 }
0x11c3   :  { %1345 = vsyncpa [#allocation3], 1 }

</bundles_post_ra>
